<compile_context>
chip_gen: v5e
topology: v5e:2x2
jax: 0.10.0
libtpu: 0.0.40
codegen_flags: <defaults>
</compile_context>

<pallas_src>
import math
import functools

import jax
import jax.numpy as jnp
from jax import lax
from jax.experimental import pallas as pl
from jax.experimental.pallas import tpu as pltpu

# ----------------------------- configuration --------------------------------
ITERATION = 1000
MAX_OUTPUT = 50
VIEW_DEPTH = 3
COMBINATION = ["012", "130"]       # exercises ops '0','1','2','3'
HIDDEN = 32
OUT = 32                           # == HIDDEN -> residual branch taken
NUM_EXAMPLES_SEEN = 200            # > ITERATION*0.1 -> new_w = w7 * mask
LN_EPS = 1e-5

B, S = 2, 8                        # batch, sequence (S <= OUT required by w8 slice)
C = len(COMBINATION)
BS = B * S

# ---- static maps of which (c, d) weight slots are actually used -------------
BIAS_SLOTS = [(c, d) for c, comb in enumerate(COMBINATION)
              for d, a in enumerate(comb) if a == '0']     # op '0' -> w0@w1 bias
MATMUL_SLOTS = [(c, d) for c, comb in enumerate(COMBINATION)
                for d, a in enumerate(comb) if a == '1']    # op '1' -> w1 matmul
BIAS_IDX = {slot: i for i, slot in enumerate(BIAS_SLOTS)}
MM_IDX = {slot: i for i, slot in enumerate(MATMUL_SLOTS)}

# ---- packed-slab row layout (all the small operands, one DMA) ----------------
ROW_W8 = 0                                  # rows 0:MAX_OUTPUT, lanes 0:S  -> w8[:, :S]
ROW_TEMP = MAX_OUTPUT                       # one row per used op-'0' bias, lanes 0:HIDDEN
ROW_W6 = ROW_TEMP + len(BIAS_SLOTS)         # w6 weight row, lanes 0:HIDDEN
ROW_NW = ROW_W6 + 1                         # C rows of (masked) w7, lanes 0:OUT
SLAB_ROWS = ((ROW_NW + C + 7) // 8) * 8     # pad rows up to a sublane tile


# ------------------------------ kernel body ----------------------------------
def _layer_norm(v, eps=LN_EPS):
    # Two-moment form: both cross-lane reductions issue back-to-back (XLU),
    # rsqrt goes to the EUP slot.  var = E[x^2] - mu^2, clamped at 0 so
    # cancellation can never produce rsqrt(negative).
    inv_n = 1.0 / v.shape[-1]
    s1 = jnp.sum(v, axis=-1, keepdims=True)
    s2 = jnp.sum(v * v, axis=-1, keepdims=True)
    mu = s1 * inv_n
    var = jnp.maximum(s2 * inv_n - mu * mu, 0.0)
    return (v - mu) * lax.rsqrt(var + eps)


def test_sublayer_kernel(x_ref, w1_ref, slab_ref, o_ref):
    # x_ref:    (B*S, HIDDEN)          batch folded into the sublane axis
    # w1_ref:   (n_mm, HIDDEN, HIDDEN) only the op-'1' w1 slots actually used
    # slab_ref: (SLAB_ROWS, 128)       packed: w8[:, :S] | bias rows | w6 row | new_w
    # o_ref:    (MAX_OUTPUT, B*OUT)    lane-dense output slab (batch in lanes)
    x = x_ref[...]

    branch_outs = []
    for c, comb in enumerate(COMBINATION):            # static, fully unrolled
        output = x
        for d, op in enumerate(comb):
            if op == '0':
                r = ROW_TEMP + BIAS_IDX[(c, d)]
                t = slab_ref[r:r + 1, 0:HIDDEN]                       # (1, H)
                output = _layer_norm(output + t)
            elif op == '1':
                w = w1_ref[MM_IDX[(c, d)]]                            # (H, H)
                output = _layer_norm(
                    jnp.dot(output, w, preferred_element_type=jnp.float32))
            elif op == '2':
                output = _layer_norm(jnp.exp(output))
            elif op == '3':
                output = jnp.maximum(output, 0.0)
        branch_outs.append(output)

    w6r = slab_ref[ROW_W6:ROW_W6 + 1, 0:HIDDEN]                       # (1, H)

    if C == 2:
        # Closed-form layernorm4 over C=2 + K=2 contraction with new_w, all on
        # VPU/XLU/EUP.  LN([a, b]) = [h, -h] * rsqrt(h^2 + eps), h = (a-b)/2,
        # so  LN([a,b]) @ new_w = h * rsqrt(h^2+eps) * (new_w[0] - new_w[1]).
        # The w6 bias cancels exactly in (a - b), so it is omitted; the two w6
        # projections collapse into a single lane-reduction on the branch diff
        # (no N=1 MXU push).
        d01 = branch_outs[0] - branch_outs[1]                         # (BS, H)
        diff = jnp.sum(d01 * w6r, axis=-1, keepdims=True)             # (BS, 1)
        half = 0.5 * diff
        n = half * lax.rsqrt(half * half + LN_EPS)                    # (BS, 1)
        nw0 = slab_ref[ROW_NW:ROW_NW + 1, 0:OUT]                      # (1, OUT)
        nw1 = slab_ref[ROW_NW + 1:ROW_NW + 2, 0:OUT]
        mixed = n * (nw0 - nw1)                                       # (BS, OUT)
    else:
        # General fallback (not traced for C == 2).
        cols = [jnp.sum(o * w6r, axis=-1, keepdims=True) for o in branch_outs]
        r = _layer_norm(jnp.concatenate(cols, axis=1))                # layernorm4
        nw = slab_ref[ROW_NW:ROW_NW + C, 0:OUT]                       # (C, OUT)
        mixed = jnp.dot(r, nw, preferred_element_type=jnp.float32)

    mixed = _layer_norm(mixed)                                        # layernorm5
    if HIDDEN == OUT:
        mixed = mixed + x                                             # residual

    # Fused tail: one (MAX_OUTPUT, S) @ (S, B*OUT) MXU dot instead of B dots,
    # then per-batch LayerNorm on the 32-lane halves and one wide store.
    w8 = slab_ref[0:MAX_OUTPUT, 0:S]                                  # (50, S)
    rcat = jnp.concatenate(
        [mixed[b * S:(b + 1) * S, :] for b in range(B)], axis=1)      # (S, B*OUT)
    y = jnp.dot(w8, rcat, preferred_element_type=jnp.float32)         # (50, B*OUT)
    halves = [_layer_norm(y[:, b * OUT:(b + 1) * OUT]) for b in range(B)]
    o_ref[...] = jnp.concatenate(halves, axis=1)                      # layernorm6


# ------------------------------ host wrapper ---------------------------------
@functools.partial(jax.jit, static_argnames=("num_examples_seen",))
def test_sublayer_forward(x, w0, w1, w6_weight, w7, w8,
                          num_examples_seen=NUM_EXAMPLES_SEEN):
    # Glue stays in plain JAX: w7 masking, operand packing, and the hoisted
    # batch-invariant op-'0' bias rows  w0[c,d] @ w1[c,d]  (only used slots).
    re_mask = (w7 <= 1e-07) & (w7 >= -1e-07)
    mask = 1.0 - re_mask.astype(jnp.float32)
    new_w = w7 * mask if num_examples_seen > ITERATION * 0.1 else w7

    # Gather only the weight slots COMBINATION actually touches.
    temp_rows = [jnp.matmul(w0[c, d], w1[c, d])[0] for (c, d) in BIAS_SLOTS]
    if MATMUL_SLOTS:
        w1_used = jnp.stack([w1[c, d] for (c, d) in MATMUL_SLOTS], axis=0)
    else:
        w1_used = jnp.zeros((1, HIDDEN, HIDDEN), jnp.float32)

    # Pack all remaining small operands into one lane-dense (SLAB_ROWS, 128)
    # slab: w8[:, :S], op-'0' bias rows, w6 weight row, (masked) w7 rows.
    slab = jnp.zeros((SLAB_ROWS, 128), jnp.float32)
    slab = slab.at[0:MAX_OUTPUT, 0:S].set(w8[:, :S])
    for i, t in enumerate(temp_rows):
        slab = slab.at[ROW_TEMP + i, 0:HIDDEN].set(t)
    slab = slab.at[ROW_W6, 0:HIDDEN].set(w6_weight[0])
    slab = slab.at[ROW_NW:ROW_NW + C, 0:OUT].set(new_w)

    x_flat = x.reshape(BS, HIDDEN)                     # fold batch into sublanes

    out2d = pl.pallas_call(
        test_sublayer_kernel,
        out_shape=jax.ShapeDtypeStruct((MAX_OUTPUT, B * OUT), jnp.float32),
        # Single grid step, whole arrays resident in VMEM (< 0.2 MiB total on
        # every TPU generation); no per-grid-step overhead, no re-DMA.
        in_specs=[pl.BlockSpec(memory_space=pltpu.MemorySpace.VMEM)] * 3,
        out_specs=pl.BlockSpec(memory_space=pltpu.MemorySpace.VMEM),
        cost_estimate=pl.CostEstimate(flops=200_000,
                                      transcendentals=1_000,
                                      bytes_accessed=45_000),
    )(x_flat, w1_used, slab)

    # Un-pack the lane-dense (50, B*OUT) slab back to (B, 50, OUT).
    out = jnp.transpose(out2d.reshape(MAX_OUTPUT, B, OUT), (1, 0, 2))
    return out, mask


# -------------------------- pure-JAX reference -------------------------------
def _layer_norm_ref(v, eps=LN_EPS):
    mu = jnp.mean(v, axis=-1, keepdims=True)
    var = jnp.mean((v - mu) ** 2, axis=-1, keepdims=True)
    return (v - mu) * lax.rsqrt(var + eps)


def test_sublayer_reference(x, w0, w1, w6_w_t, w6_b, w7, w8,
                            num_examples_seen=NUM_EXAMPLES_SEEN):
    result = []
    residual = x
    for i1, comb in enumerate(COMBINATION):
        output = x
        for i2, a in enumerate(comb):
            b = w1[i1, i2]
            if a == '0':
                output = _layer_norm_ref(output + jnp.dot(w0[i1, i2], b))
            elif a == '1':
                output = _layer_norm_ref(jnp.matmul(output, b))
            elif a == '2':
                output = _layer_norm_ref(jnp.exp(output))
            elif a == '3':
                output = jnp.maximum(output, 0.0)
        result.append(jnp.matmul(output, w6_w_t) + w6_b[0, 0])
    result = jnp.concatenate(result, axis=2)
    result = _layer_norm_ref(result)
    re_mask = (w7 <= 1e-07) & (w7 >= -1e-07)
    mask = 1.0 - re_mask.astype(jnp.float32)
    new_w = w7 * mask if num_examples_seen > ITERATION * 0.1 else w7
    result = jnp.matmul(result, new_w)
    result = _layer_norm_ref(result)
    if HIDDEN == OUT:
        result = result + residual
    result = jnp.matmul(w8[:, :result.shape[1]], result)
    result = _layer_norm_ref(result)
    return result, mask


# ----------------------------- parameter init --------------------------------
def xavier_normal(key, shape):
    if len(shape) >= 2:
        receptive = math.prod(shape[2:]) if len(shape) > 2 else 1
        fan_in = shape[1] * receptive
        fan_out = shape[0] * receptive
    else:
        fan_in = fan_out = shape[0]
    std = math.sqrt(2.0 / (fan_in + fan_out))
    return std * jax.random.normal(key, shape, dtype=jnp.float32)


if __name__ == "__main__":
    key = jax.random.PRNGKey(0)
    kx, k0, k1, k6w, k6b, k7, k8 = jax.random.split(key, 7)

    x = jax.random.normal(kx, (B, S, HIDDEN), dtype=jnp.float32)
    w0 = xavier_normal(k0, (C, VIEW_DEPTH, 1, HIDDEN))
    w1 = xavier_normal(k1, (C, VIEW_DEPTH, HIDDEN, HIDDEN))
    w6_weight = xavier_normal(k6w, (1, HIDDEN))            # nn.Linear(hidden, 1).weight
    w6_w_t = jnp.transpose(w6_weight)                      # (HIDDEN, 1), reference only
    bound = 1.0 / math.sqrt(HIDDEN)
    w6_b = jax.random.uniform(k6b, (1, 1), jnp.float32, -bound, bound)
    w7 = xavier_normal(k7, (C, OUT))
    w8 = xavier_normal(k8, (MAX_OUTPUT, OUT))

    out, mask = test_sublayer_forward(x, w0, w1, w6_weight, w7, w8)
    out = jax.block_until_ready(out)
    mask = jax.block_until_ready(mask)

    # Reference keeps the w6 bias; it is mathematically cancelled by
    # layernorm4 (shift invariance), so results match up to rounding.
    ref_out, ref_mask = test_sublayer_reference(x, w0, w1, w6_w_t, w6_b, w7, w8)
    assert out.shape == (B, MAX_OUTPUT, OUT)
    assert mask.shape == (C, OUT)
    assert jnp.allclose(out, ref_out, rtol=1e-2, atol=1e-2)
    assert jnp.allclose(mask, ref_mask)

    print("KERNEL_OK")
</pallas_src>

<mosaic_0001>
module attributes {stable_mosaic.version = 11 : i64} {
  func.func @test_sublayer_kernel(%arg0: memref<16x32xf32, #tpu.memory_space<vmem>>, %arg1: memref<2x32x32xf32, #tpu.memory_space<vmem>>, %arg2: memref<56x128xf32, #tpu.memory_space<vmem>>, %arg3: memref<50x64xf32, #tpu.memory_space<vmem>>) attributes {dimension_semantics = [], scalar_prefetch = 0 : i64, scratch_operands = 0 : i64, tpu.core_type = #tpu.core_type<tc>} {
    %c0 = arith.constant 0 : index
    %c0_0 = arith.constant 0 : index
    %0 = vector.load %arg0[%c0, %c0_0] : memref<16x32xf32, #tpu.memory_space<vmem>>, vector<16x32xf32>
    %c50 = arith.constant 50 : index
    %c0_1 = arith.constant 0 : index
    %1 = vector.load %arg2[%c50, %c0_1] : memref<56x128xf32, #tpu.memory_space<vmem>>, vector<1x32xf32>
    %2 = vector.broadcast %1 : vector<1x32xf32> to vector<16x32xf32>
    %3 = arith.addf %0, %2 : vector<16x32xf32>
    %cst = arith.constant dense<0.000000e+00> : vector<16xf32>
    %4 = vector.multi_reduction <add>, %3, %cst [1] : vector<16x32xf32> to vector<16xf32>
    %5 = vector.shape_cast %4 : vector<16xf32> to vector<16x1xf32>
    %6 = arith.mulf %3, %3 : vector<16x32xf32>
    %cst_2 = arith.constant dense<0.000000e+00> : vector<16xf32>
    %7 = vector.multi_reduction <add>, %6, %cst_2 [1] : vector<16x32xf32> to vector<16xf32>
    %8 = vector.shape_cast %7 : vector<16xf32> to vector<16x1xf32>
    %cst_3 = arith.constant 3.125000e-02 : f32
    %9 = vector.broadcast %cst_3 : f32 to vector<16x1xf32>
    %10 = arith.mulf %5, %9 : vector<16x1xf32>
    %cst_4 = arith.constant 3.125000e-02 : f32
    %11 = vector.broadcast %cst_4 : f32 to vector<16x1xf32>
    %12 = arith.mulf %8, %11 : vector<16x1xf32>
    %13 = arith.mulf %10, %10 : vector<16x1xf32>
    %14 = arith.subf %12, %13 : vector<16x1xf32>
    %cst_5 = arith.constant 0.000000e+00 : f32
    %15 = vector.broadcast %cst_5 : f32 to vector<16x1xf32>
    %16 = arith.maximumf %14, %15 : vector<16x1xf32>
    %17 = vector.broadcast %10 : vector<16x1xf32> to vector<16x32xf32>
    %18 = arith.subf %3, %17 : vector<16x32xf32>
    %cst_6 = arith.constant 9.99999974E-6 : f32
    %19 = vector.broadcast %cst_6 : f32 to vector<16x1xf32>
    %20 = arith.addf %16, %19 : vector<16x1xf32>
    %21 = math.rsqrt %20 : vector<16x1xf32>
    %22 = vector.broadcast %21 : vector<16x1xf32> to vector<16x32xf32>
    %23 = arith.mulf %18, %22 : vector<16x32xf32>
    %c0_7 = arith.constant 0 : index
    %c0_8 = arith.constant 0 : index
    %c0_9 = arith.constant 0 : index
    %24 = vector.load %arg1[%c0_7, %c0_8, %c0_9] : memref<2x32x32xf32, #tpu.memory_space<vmem>>, vector<1x32x32xf32>
    %25 = vector.shape_cast %24 : vector<1x32x32xf32> to vector<32x32xf32>
    %cst_10 = arith.constant dense<0.000000e+00> : vector<16x32xf32>
    %26 = tpu.matmul %23, %25, %cst_10 {dimension_numbers = #tpu.dot_dimension_numbers<[1], [0], [0], [1], [0, 0, 1, 1], [], []>} : vector<16x32xf32>, vector<32x32xf32>, vector<16x32xf32> -> vector<16x32xf32>
    %cst_11 = arith.constant dense<0.000000e+00> : vector<16xf32>
    %27 = vector.multi_reduction <add>, %26, %cst_11 [1] : vector<16x32xf32> to vector<16xf32>
    %28 = vector.shape_cast %27 : vector<16xf32> to vector<16x1xf32>
    %29 = arith.mulf %26, %26 : vector<16x32xf32>
    %cst_12 = arith.constant dense<0.000000e+00> : vector<16xf32>
    %30 = vector.multi_reduction <add>, %29, %cst_12 [1] : vector<16x32xf32> to vector<16xf32>
    %31 = vector.shape_cast %30 : vector<16xf32> to vector<16x1xf32>
    %cst_13 = arith.constant 3.125000e-02 : f32
    %32 = vector.broadcast %cst_13 : f32 to vector<16x1xf32>
    %33 = arith.mulf %28, %32 : vector<16x1xf32>
    %cst_14 = arith.constant 3.125000e-02 : f32
    %34 = vector.broadcast %cst_14 : f32 to vector<16x1xf32>
    %35 = arith.mulf %31, %34 : vector<16x1xf32>
    %36 = arith.mulf %33, %33 : vector<16x1xf32>
    %37 = arith.subf %35, %36 : vector<16x1xf32>
    %cst_15 = arith.constant 0.000000e+00 : f32
    %38 = vector.broadcast %cst_15 : f32 to vector<16x1xf32>
    %39 = arith.maximumf %37, %38 : vector<16x1xf32>
    %40 = vector.broadcast %33 : vector<16x1xf32> to vector<16x32xf32>
    %41 = arith.subf %26, %40 : vector<16x32xf32>
    %cst_16 = arith.constant 9.99999974E-6 : f32
    %42 = vector.broadcast %cst_16 : f32 to vector<16x1xf32>
    %43 = arith.addf %39, %42 : vector<16x1xf32>
    %44 = math.rsqrt %43 : vector<16x1xf32>
    %45 = vector.broadcast %44 : vector<16x1xf32> to vector<16x32xf32>
    %46 = arith.mulf %41, %45 : vector<16x32xf32>
    %47 = math.exp %46 : vector<16x32xf32>
    %cst_17 = arith.constant dense<0.000000e+00> : vector<16xf32>
    %48 = vector.multi_reduction <add>, %47, %cst_17 [1] : vector<16x32xf32> to vector<16xf32>
    %49 = vector.shape_cast %48 : vector<16xf32> to vector<16x1xf32>
    %50 = arith.mulf %47, %47 : vector<16x32xf32>
    %cst_18 = arith.constant dense<0.000000e+00> : vector<16xf32>
    %51 = vector.multi_reduction <add>, %50, %cst_18 [1] : vector<16x32xf32> to vector<16xf32>
    %52 = vector.shape_cast %51 : vector<16xf32> to vector<16x1xf32>
    %cst_19 = arith.constant 3.125000e-02 : f32
    %53 = vector.broadcast %cst_19 : f32 to vector<16x1xf32>
    %54 = arith.mulf %49, %53 : vector<16x1xf32>
    %cst_20 = arith.constant 3.125000e-02 : f32
    %55 = vector.broadcast %cst_20 : f32 to vector<16x1xf32>
    %56 = arith.mulf %52, %55 : vector<16x1xf32>
    %57 = arith.mulf %54, %54 : vector<16x1xf32>
    %58 = arith.subf %56, %57 : vector<16x1xf32>
    %cst_21 = arith.constant 0.000000e+00 : f32
    %59 = vector.broadcast %cst_21 : f32 to vector<16x1xf32>
    %60 = arith.maximumf %58, %59 : vector<16x1xf32>
    %61 = vector.broadcast %54 : vector<16x1xf32> to vector<16x32xf32>
    %62 = arith.subf %47, %61 : vector<16x32xf32>
    %cst_22 = arith.constant 9.99999974E-6 : f32
    %63 = vector.broadcast %cst_22 : f32 to vector<16x1xf32>
    %64 = arith.addf %60, %63 : vector<16x1xf32>
    %65 = math.rsqrt %64 : vector<16x1xf32>
    %66 = vector.broadcast %65 : vector<16x1xf32> to vector<16x32xf32>
    %67 = arith.mulf %62, %66 : vector<16x32xf32>
    %c1 = arith.constant 1 : index
    %c0_23 = arith.constant 0 : index
    %c0_24 = arith.constant 0 : index
    %68 = vector.load %arg1[%c1, %c0_23, %c0_24] : memref<2x32x32xf32, #tpu.memory_space<vmem>>, vector<1x32x32xf32>
    %69 = vector.shape_cast %68 : vector<1x32x32xf32> to vector<32x32xf32>
    %cst_25 = arith.constant dense<0.000000e+00> : vector<16x32xf32>
    %70 = tpu.matmul %0, %69, %cst_25 {dimension_numbers = #tpu.dot_dimension_numbers<[1], [0], [0], [1], [0, 0, 1, 1], [], []>} : vector<16x32xf32>, vector<32x32xf32>, vector<16x32xf32> -> vector<16x32xf32>
    %cst_26 = arith.constant dense<0.000000e+00> : vector<16xf32>
    %71 = vector.multi_reduction <add>, %70, %cst_26 [1] : vector<16x32xf32> to vector<16xf32>
    %72 = vector.shape_cast %71 : vector<16xf32> to vector<16x1xf32>
    %73 = arith.mulf %70, %70 : vector<16x32xf32>
    %cst_27 = arith.constant dense<0.000000e+00> : vector<16xf32>
    %74 = vector.multi_reduction <add>, %73, %cst_27 [1] : vector<16x32xf32> to vector<16xf32>
    %75 = vector.shape_cast %74 : vector<16xf32> to vector<16x1xf32>
    %cst_28 = arith.constant 3.125000e-02 : f32
    %76 = vector.broadcast %cst_28 : f32 to vector<16x1xf32>
    %77 = arith.mulf %72, %76 : vector<16x1xf32>
    %cst_29 = arith.constant 3.125000e-02 : f32
    %78 = vector.broadcast %cst_29 : f32 to vector<16x1xf32>
    %79 = arith.mulf %75, %78 : vector<16x1xf32>
    %80 = arith.mulf %77, %77 : vector<16x1xf32>
    %81 = arith.subf %79, %80 : vector<16x1xf32>
    %cst_30 = arith.constant 0.000000e+00 : f32
    %82 = vector.broadcast %cst_30 : f32 to vector<16x1xf32>
    %83 = arith.maximumf %81, %82 : vector<16x1xf32>
    %84 = vector.broadcast %77 : vector<16x1xf32> to vector<16x32xf32>
    %85 = arith.subf %70, %84 : vector<16x32xf32>
    %cst_31 = arith.constant 9.99999974E-6 : f32
    %86 = vector.broadcast %cst_31 : f32 to vector<16x1xf32>
    %87 = arith.addf %83, %86 : vector<16x1xf32>
    %88 = math.rsqrt %87 : vector<16x1xf32>
    %89 = vector.broadcast %88 : vector<16x1xf32> to vector<16x32xf32>
    %90 = arith.mulf %85, %89 : vector<16x32xf32>
    %cst_32 = arith.constant 0.000000e+00 : f32
    %91 = vector.broadcast %cst_32 : f32 to vector<16x32xf32>
    %92 = arith.maximumf %90, %91 : vector<16x32xf32>
    %c51 = arith.constant 51 : index
    %c0_33 = arith.constant 0 : index
    %93 = vector.load %arg2[%c51, %c0_33] : memref<56x128xf32, #tpu.memory_space<vmem>>, vector<1x32xf32>
    %94 = vector.broadcast %93 : vector<1x32xf32> to vector<16x32xf32>
    %95 = arith.addf %92, %94 : vector<16x32xf32>
    %cst_34 = arith.constant dense<0.000000e+00> : vector<16xf32>
    %96 = vector.multi_reduction <add>, %95, %cst_34 [1] : vector<16x32xf32> to vector<16xf32>
    %97 = vector.shape_cast %96 : vector<16xf32> to vector<16x1xf32>
    %98 = arith.mulf %95, %95 : vector<16x32xf32>
    %cst_35 = arith.constant dense<0.000000e+00> : vector<16xf32>
    %99 = vector.multi_reduction <add>, %98, %cst_35 [1] : vector<16x32xf32> to vector<16xf32>
    %100 = vector.shape_cast %99 : vector<16xf32> to vector<16x1xf32>
    %cst_36 = arith.constant 3.125000e-02 : f32
    %101 = vector.broadcast %cst_36 : f32 to vector<16x1xf32>
    %102 = arith.mulf %97, %101 : vector<16x1xf32>
    %cst_37 = arith.constant 3.125000e-02 : f32
    %103 = vector.broadcast %cst_37 : f32 to vector<16x1xf32>
    %104 = arith.mulf %100, %103 : vector<16x1xf32>
    %105 = arith.mulf %102, %102 : vector<16x1xf32>
    %106 = arith.subf %104, %105 : vector<16x1xf32>
    %cst_38 = arith.constant 0.000000e+00 : f32
    %107 = vector.broadcast %cst_38 : f32 to vector<16x1xf32>
    %108 = arith.maximumf %106, %107 : vector<16x1xf32>
    %109 = vector.broadcast %102 : vector<16x1xf32> to vector<16x32xf32>
    %110 = arith.subf %95, %109 : vector<16x32xf32>
    %cst_39 = arith.constant 9.99999974E-6 : f32
    %111 = vector.broadcast %cst_39 : f32 to vector<16x1xf32>
    %112 = arith.addf %108, %111 : vector<16x1xf32>
    %113 = math.rsqrt %112 : vector<16x1xf32>
    %114 = vector.broadcast %113 : vector<16x1xf32> to vector<16x32xf32>
    %115 = arith.mulf %110, %114 : vector<16x32xf32>
    %c52 = arith.constant 52 : index
    %c0_40 = arith.constant 0 : index
    %116 = vector.load %arg2[%c52, %c0_40] : memref<56x128xf32, #tpu.memory_space<vmem>>, vector<1x32xf32>
    %117 = arith.subf %67, %115 : vector<16x32xf32>
    %118 = vector.broadcast %116 : vector<1x32xf32> to vector<16x32xf32>
    %119 = arith.mulf %117, %118 : vector<16x32xf32>
    %cst_41 = arith.constant dense<0.000000e+00> : vector<16xf32>
    %120 = vector.multi_reduction <add>, %119, %cst_41 [1] : vector<16x32xf32> to vector<16xf32>
    %121 = vector.shape_cast %120 : vector<16xf32> to vector<16x1xf32>
    %cst_42 = arith.constant 5.000000e-01 : f32
    %122 = vector.broadcast %cst_42 : f32 to vector<16x1xf32>
    %123 = arith.mulf %122, %121 : vector<16x1xf32>
    %124 = arith.mulf %123, %123 : vector<16x1xf32>
    %cst_43 = arith.constant 9.99999974E-6 : f32
    %125 = vector.broadcast %cst_43 : f32 to vector<16x1xf32>
    %126 = arith.addf %124, %125 : vector<16x1xf32>
    %127 = math.rsqrt %126 : vector<16x1xf32>
    %128 = arith.mulf %123, %127 : vector<16x1xf32>
    %c53 = arith.constant 53 : index
    %c0_44 = arith.constant 0 : index
    %129 = vector.load %arg2[%c53, %c0_44] : memref<56x128xf32, #tpu.memory_space<vmem>>, vector<1x32xf32>
    %c54 = arith.constant 54 : index
    %c0_45 = arith.constant 0 : index
    %130 = vector.load %arg2[%c54, %c0_45] : memref<56x128xf32, #tpu.memory_space<vmem>>, vector<1x32xf32>
    %131 = arith.subf %129, %130 : vector<1x32xf32>
    %132 = vector.broadcast %128 : vector<16x1xf32> to vector<16x32xf32>
    %133 = vector.broadcast %131 : vector<1x32xf32> to vector<16x32xf32>
    %134 = arith.mulf %132, %133 : vector<16x32xf32>
    %cst_46 = arith.constant dense<0.000000e+00> : vector<16xf32>
    %135 = vector.multi_reduction <add>, %134, %cst_46 [1] : vector<16x32xf32> to vector<16xf32>
    %136 = vector.shape_cast %135 : vector<16xf32> to vector<16x1xf32>
    %137 = arith.mulf %134, %134 : vector<16x32xf32>
    %cst_47 = arith.constant dense<0.000000e+00> : vector<16xf32>
    %138 = vector.multi_reduction <add>, %137, %cst_47 [1] : vector<16x32xf32> to vector<16xf32>
    %139 = vector.shape_cast %138 : vector<16xf32> to vector<16x1xf32>
    %cst_48 = arith.constant 3.125000e-02 : f32
    %140 = vector.broadcast %cst_48 : f32 to vector<16x1xf32>
    %141 = arith.mulf %136, %140 : vector<16x1xf32>
    %cst_49 = arith.constant 3.125000e-02 : f32
    %142 = vector.broadcast %cst_49 : f32 to vector<16x1xf32>
    %143 = arith.mulf %139, %142 : vector<16x1xf32>
    %144 = arith.mulf %141, %141 : vector<16x1xf32>
    %145 = arith.subf %143, %144 : vector<16x1xf32>
    %cst_50 = arith.constant 0.000000e+00 : f32
    %146 = vector.broadcast %cst_50 : f32 to vector<16x1xf32>
    %147 = arith.maximumf %145, %146 : vector<16x1xf32>
    %148 = vector.broadcast %141 : vector<16x1xf32> to vector<16x32xf32>
    %149 = arith.subf %134, %148 : vector<16x32xf32>
    %cst_51 = arith.constant 9.99999974E-6 : f32
    %150 = vector.broadcast %cst_51 : f32 to vector<16x1xf32>
    %151 = arith.addf %147, %150 : vector<16x1xf32>
    %152 = math.rsqrt %151 : vector<16x1xf32>
    %153 = vector.broadcast %152 : vector<16x1xf32> to vector<16x32xf32>
    %154 = arith.mulf %149, %153 : vector<16x32xf32>
    %155 = arith.addf %154, %0 : vector<16x32xf32>
    %c0_52 = arith.constant 0 : index
    %c0_53 = arith.constant 0 : index
    %156 = vector.load %arg2[%c0_52, %c0_53] : memref<56x128xf32, #tpu.memory_space<vmem>>, vector<50x8xf32>
    %157 = vector.extract_strided_slice %155 {offsets = [0, 0], sizes = [8, 32], strides = [1, 1]} : vector<16x32xf32> to vector<8x32xf32>
    %158 = vector.extract_strided_slice %155 {offsets = [8, 0], sizes = [8, 32], strides = [1, 1]} : vector<16x32xf32> to vector<8x32xf32>
    %159 = tpu.concatenate %157, %158 in 1 : vector<8x32xf32>, vector<8x32xf32> -> vector<8x64xf32>
    %cst_54 = arith.constant dense<0.000000e+00> : vector<50x64xf32>
    %160 = tpu.matmul %156, %159, %cst_54 {dimension_numbers = #tpu.dot_dimension_numbers<[1], [0], [0], [1], [0, 0, 1, 1], [], []>} : vector<50x8xf32>, vector<8x64xf32>, vector<50x64xf32> -> vector<50x64xf32>
    %161 = vector.extract_strided_slice %160 {offsets = [0, 0], sizes = [50, 32], strides = [1, 1]} : vector<50x64xf32> to vector<50x32xf32>
    %cst_55 = arith.constant dense<0.000000e+00> : vector<50xf32>
    %162 = vector.multi_reduction <add>, %161, %cst_55 [1] : vector<50x32xf32> to vector<50xf32>
    %163 = vector.shape_cast %162 : vector<50xf32> to vector<50x1xf32>
    %164 = arith.mulf %161, %161 : vector<50x32xf32>
    %cst_56 = arith.constant dense<0.000000e+00> : vector<50xf32>
    %165 = vector.multi_reduction <add>, %164, %cst_56 [1] : vector<50x32xf32> to vector<50xf32>
    %166 = vector.shape_cast %165 : vector<50xf32> to vector<50x1xf32>
    %cst_57 = arith.constant 3.125000e-02 : f32
    %167 = vector.broadcast %cst_57 : f32 to vector<50x1xf32>
    %168 = arith.mulf %163, %167 : vector<50x1xf32>
    %cst_58 = arith.constant 3.125000e-02 : f32
    %169 = vector.broadcast %cst_58 : f32 to vector<50x1xf32>
    %170 = arith.mulf %166, %169 : vector<50x1xf32>
    %171 = arith.mulf %168, %168 : vector<50x1xf32>
    %172 = arith.subf %170, %171 : vector<50x1xf32>
    %cst_59 = arith.constant 0.000000e+00 : f32
    %173 = vector.broadcast %cst_59 : f32 to vector<50x1xf32>
    %174 = arith.maximumf %172, %173 : vector<50x1xf32>
    %175 = vector.broadcast %168 : vector<50x1xf32> to vector<50x32xf32>
    %176 = arith.subf %161, %175 : vector<50x32xf32>
    %cst_60 = arith.constant 9.99999974E-6 : f32
    %177 = vector.broadcast %cst_60 : f32 to vector<50x1xf32>
    %178 = arith.addf %174, %177 : vector<50x1xf32>
    %179 = math.rsqrt %178 : vector<50x1xf32>
    %180 = vector.broadcast %179 : vector<50x1xf32> to vector<50x32xf32>
    %181 = arith.mulf %176, %180 : vector<50x32xf32>
    %182 = vector.extract_strided_slice %160 {offsets = [0, 32], sizes = [50, 32], strides = [1, 1]} : vector<50x64xf32> to vector<50x32xf32>
    %cst_61 = arith.constant dense<0.000000e+00> : vector<50xf32>
    %183 = vector.multi_reduction <add>, %182, %cst_61 [1] : vector<50x32xf32> to vector<50xf32>
    %184 = vector.shape_cast %183 : vector<50xf32> to vector<50x1xf32>
    %185 = arith.mulf %182, %182 : vector<50x32xf32>
    %cst_62 = arith.constant dense<0.000000e+00> : vector<50xf32>
    %186 = vector.multi_reduction <add>, %185, %cst_62 [1] : vector<50x32xf32> to vector<50xf32>
    %187 = vector.shape_cast %186 : vector<50xf32> to vector<50x1xf32>
    %cst_63 = arith.constant 3.125000e-02 : f32
    %188 = vector.broadcast %cst_63 : f32 to vector<50x1xf32>
    %189 = arith.mulf %184, %188 : vector<50x1xf32>
    %cst_64 = arith.constant 3.125000e-02 : f32
    %190 = vector.broadcast %cst_64 : f32 to vector<50x1xf32>
    %191 = arith.mulf %187, %190 : vector<50x1xf32>
    %192 = arith.mulf %189, %189 : vector<50x1xf32>
    %193 = arith.subf %191, %192 : vector<50x1xf32>
    %cst_65 = arith.constant 0.000000e+00 : f32
    %194 = vector.broadcast %cst_65 : f32 to vector<50x1xf32>
    %195 = arith.maximumf %193, %194 : vector<50x1xf32>
    %196 = vector.broadcast %189 : vector<50x1xf32> to vector<50x32xf32>
    %197 = arith.subf %182, %196 : vector<50x32xf32>
    %cst_66 = arith.constant 9.99999974E-6 : f32
    %198 = vector.broadcast %cst_66 : f32 to vector<50x1xf32>
    %199 = arith.addf %195, %198 : vector<50x1xf32>
    %200 = math.rsqrt %199 : vector<50x1xf32>
    %201 = vector.broadcast %200 : vector<50x1xf32> to vector<50x32xf32>
    %202 = arith.mulf %197, %201 : vector<50x32xf32>
    %203 = tpu.concatenate %181, %202 in 1 : vector<50x32xf32>, vector<50x32xf32> -> vector<50x64xf32>
    %c0_67 = arith.constant 0 : index
    %c0_68 = arith.constant 0 : index
    %204 = vector.load %arg3[%c0_67, %c0_68] : memref<50x64xf32, #tpu.memory_space<vmem>>, vector<50x64xf32>
    tpu.vector_store %arg3[%c0_67, %c0_68], %203 {strides = array<i32>} : memref<50x64xf32, #tpu.memory_space<vmem>>, vector<50x64xf32>,
    return
  }
}

</mosaic_0001>

<bundles_post_ra>
// kernel: test_sublayer_forward.1
= control target key start
LH: loop header
LB: loop body
LE: loop exit
PB: predicated region body
PF: predicated region fallthrough
CT: control target
= control target key end

     0   :  { %vm20_vm0 = vcmask 261120   ;;  %s1019_s13 = smov 32   ;;  %s1020_s27 = smov 96   ;;  %s1424_s1 = inlined_call_operand.vmem [shape: f32[2,32,32], index: 1, kind: input, shape index: {}]   ;;  %s1425_s0 = inlined_call_operand.vmem [shape: f32[16,32], index: 0, kind: input, shape index: {}]   ;;  %s1426_s2 = inlined_call_operand.vmem [shape: f32[56,128], index: 2, kind: input, shape index: {}]   ;;  %s1427_s3 = inlined_call_operand.vmem [shape: f32[50,64], index: 3, kind: output, shape index: {}]  }
   0x1   :  { %v943_v0 = vld [vmem:[%s1424_s1 + $0x38] sm:$0xff]  ;;  %v942_v1 = vld [vmem:[%s1424_s1 + $0x30] sm:$0xff]  ;;  %v1050_v2 = vld [vmem:[%s1425_s0 + $0x8] sm:$0xff] }
   0x2   :  { %231 = vmatpush.msra.mxu1 %v943_v0  ;;  %v956_v3 = vld [vmem:[%s1426_s2 + $0x32] ss:$0 sm:$0xff]  ;;  %v941_v4 = vld [vmem:[%s1424_s1 + $0x28] sm:$0xff]  ;;  %v1061_v5 = vld [vmem:[%s1425_s0] sm:$0xff] }
   0x3   :  { %v1064_v6 = vadd.f32 %v956_v3, %v1050_v2  ;;  %v1067_v7 = vadd.f32 %v956_v3, %v1061_v5  ;;  %v940_v8 = vld [vmem:[%s1424_s1 + $0x20] sm:$0xff]  ;;  %v74_v15 = vld [vmem:[%s1424_s1 + $0x18] sm:$0xff]  ;;  %v73_v16 = vld [vmem:[%s1424_s1 + $0x10] sm:$0xff] }
   0x4   :  { %232 = vmatpush.msra.mxu1 %v942_v1  ;;  %93 = vmatpush.msra.mxu0 %v74_v15  ;;  %v72_v19 = vld [vmem:[%s1424_s1 + $0x8] sm:$0xff]  ;;  %v71_v20 = vld [vmem:[%s1424_s1] sm:$0xff] }
   0x5   :  { %v24_v9 = vsel %vm20_vm0, %v1064_v6, 0.0  ;;  %v21_v10 = vsel %vm20_vm0, %v1067_v7, 0.0  ;;  %v28_v11 = vmul.f32 %v1064_v6, %v1064_v6  ;;  %v27_v12 = vmul.f32 %v1067_v7, %v1067_v7 }
   0x6   :  { %233 = vmatpush.msra.mxu1 %v941_v4  ;;  %25 = vadd.xlane.f32.xlu1 %v24_v9 }
   0x7   :  { %22 = vadd.xlane.f32.xlu0 %v21_v10  ;;  %v32_v13 = vsel %vm20_vm0, %v28_v11, 0.0  ;;  %v29_v14 = vsel %vm20_vm0, %v27_v12, 0.0  ;;  %94 = vmatpush.msra.mxu0 %v73_v16 }
   0x8   :  { %234 = vmatpush.msra.mxu1 %v940_v8 }
   0x9   :  { %944 = vmatmul.msk.f32.vlgmr.msra.gmra.mxu1 %vm20_vm0, %v1061_v5  ;;  %95 = vmatpush.msra.mxu0 %v72_v19 }
   0xb   :  { %96 = vmatpush.msra.mxu0 %v71_v20 }
   0xe   :  { %33 = vadd.xlane.f32.xlu1 %v32_v13 }
   0xf   :  { %30 = vadd.xlane.f32.xlu0 %v29_v14 }
  0x11   :  { %945 = vmatmul.msk.f32.gmra.mxu1 %vm20_vm0, %v1050_v2 }
  0x79   :  { %v26_v17 = vpop.xlane.xlu1 %25 }
  0x7a   :  { %v23_v18 = vpop.xlane.xlu0 %22  ;;  %v36_v21 = vmul.f32 0.03125, %v26_v17  ;;  %v1116_v17 = vld [vmem:[%s1426_s2 + $0x33] ss:$0 sm:$0xff] }
  0x7b   :  { %v35_v22 = vmul.f32 0.03125, %v23_v18 }
  0x7c   :  { %v40_v23 = vmul.f32 %v36_v21, %v36_v21  ;;  %v46_v57 = vsub.f32 %v1064_v6, %v36_v21 }
  0x7d   :  { %v39_v26 = vmul.f32 %v35_v22, %v35_v22  ;;  %v45_v52 = vsub.f32 %v1067_v7, %v35_v22 }
  0x81   :  { %v34_v24 = vpop.xlane.xlu1 %33 }
  0x82   :  { %v31_v25 = vpop.xlane.xlu0 %30  ;;  %v38_v27 = vmul.f32 0.03125, %v34_v24 }
  0x83   :  { %v37_v28 = vmul.f32 0.03125, %v31_v25 }
  0x84   :  { %v42_v29 = vsub.f32 %v38_v27, %v40_v23 }
  0x85   :  { %v41_v30 = vsub.f32 %v37_v28, %v39_v26 }
  0x86   :  { %v1098_v31 = vpop.f32.mrf.mxu1  ;;  %v44_v32 = vmax.f32 %v42_v29, 0.0 }
  0x87   :  { %v43_v33 = vmax.f32 %v41_v30, 0.0  ;;  %v242_v48 = vsel %vm20_vm0, %v1098_v31, 0.0  ;;  %v248_v26 = vmul.f32 %v1098_v31, %v1098_v31 }
  0x88   :  { %v48_v34 = vadd.f32 1e-05, %v44_v32 }
  0x89   :  { %v47_v35 = vadd.f32 1e-05, %v43_v33  ;;  %v250_v27 = vsel %vm20_vm0, %v248_v26, 0.0 }
  0x8a   :  { %959 = vrsqrt.f32 %v48_v34  ;;  %vm65_vm5 = vweird.f32 %v48_v34 }
  0x8b   :  { %961 = vrsqrt.f32 %v47_v35  ;;  %vm55_vm2 = vweird.f32 %v47_v35 }
  0x8e   :  { %v239_v36 = vpop.f32.mrf.mxu1 }
  0x8f   :  { %v249_v37 = vmul.f32 %v239_v36, %v239_v36  ;;  %v245_v38 = vsel %vm20_vm0, %v239_v36, 0.0 }
  0x90   :  { %246 = vadd.xlane.f32.xlu0 %v245_v38  ;;  %v960_v39 = vpop.eup %959 }
  0x91   :  { %v253_v40 = vsel %vm20_vm0, %v249_v37, 0.0  ;;  %v962_v41 = vpop.eup %961  ;;  %v60_v42 = vmul.f32 %v960_v39, %v48_v34  ;;  %vm66_vm4 = vweird.f32 %v960_v39 }
  0x92   :  { %254 = vadd.xlane.f32.xlu1 %v253_v40  ;;  %v50_v43 = vmul.f32 %v962_v41, %v47_v35  ;;  %vm56_vm1 = vweird.f32 %v962_v41  ;;  %vm67_vm6 = vmor %vm65_vm5, %vm66_vm4 }
  0x93   :  { %v61_v44 = vmul.f32 %v960_v39, %v60_v42  ;;  %vm57_vm3 = vmor %vm55_vm2, %vm56_vm1 }
  0x94   :  { %v51_v45 = vmul.f32 %v962_v41, %v50_v43 }
  0x95   :  { %v62_v46 = vmul.f32 0.5, %v61_v44 }
  0x96   :  { %v52_v47 = vmul.f32 0.5, %v51_v45 }
  0x97   :  { %v63_v50 = vsub.f32 1.5, %v62_v46 }
  0x98   :  { %v53_v49 = vsub.f32 1.5, %v52_v47 }
  0x99   :  { %v64_v55 = vmul.f32 %v960_v39, %v63_v50 }
  0x9a   :  { %243 = vadd.xlane.f32.xlu1 %v242_v48  ;;  %v54_v51 = vmul.f32 %v962_v41, %v53_v49 }
  0x9b   :  { %v68_v56 = vsel %vm67_vm6, %v960_v39, %v64_v55 }
  0x9c   :  { %v58_v53 = vsel %vm57_vm3, %v962_v41, %v54_v51  ;;  %v70_v58 = vmul.f32 %v68_v56, %v46_v57 }
  0x9d   :  { %v69_v54 = vmul.f32 %v58_v53, %v45_v52 }
  0x9f   :  { %938 = vmatmul.msk.f32.vlgmr.msra.gmra.mxu0 %vm20_vm0, %v69_v54 }
  0xa7   :  { %939 = vmatmul.msk.f32.gmra.mxu0 %vm20_vm0, %v70_v58 }
 0x103   :  { %v247_v59 = vpop.xlane.xlu0 %246 }
 0x104   :  { %v257_v60 = vmul.f32 0.03125, %v247_v59 }
 0x105   :  { %v255_v61 = vpop.xlane.xlu1 %254 }
 0x106   :  { %v261_v62 = vmul.f32 %v257_v60, %v257_v60  ;;  %v259_v63 = vmul.f32 0.03125, %v255_v61  ;;  %v267_v6 = vsub.f32 %v239_v36, %v257_v60 }
 0x108   :  { %v263_v0 = vsub.f32 %v259_v63, %v261_v62 }
 0x10a   :  { %v265_v1 = vmax.f32 %v263_v0, 0.0 }
 0x10c   :  { %v269_v3 = vadd.f32 1e-05, %v265_v1 }
 0x10d   :  { %v244_v42 = vpop.xlane.xlu1 %243 }
 0x10e   :  { %963 = vrsqrt.f32 %v269_v3  ;;  %vm286_vm7 = vweird.f32 %v269_v3  ;;  %v256_v45 = vmul.f32 0.03125, %v244_v42 }
 0x110   :  { %v260_v49 = vmul.f32 %v256_v45, %v256_v45 }
 0x114   :  { %v964_v4 = vpop.eup %963 }
 0x115   :  { %v281_v7 = vmul.f32 %v964_v4, %v269_v3  ;;  %vm287_vm8 = vweird.f32 %v964_v4 }
 0x116   :  { %vm288_vm9 = vmor %vm286_vm7, %vm287_vm8 }
 0x117   :  { %v282_v8 = vmul.f32 %v964_v4, %v281_v7 }
 0x119   :  { %v283_v9 = vmul.f32 0.5, %v282_v8 }
 0x11b   :  { %v284_v10 = vsub.f32 1.5, %v283_v9 }
 0x11c   :  { %v1108_v11 = vpop.f32.mrf.mxu0 }
 0x11d   :  { %v285_v12 = vmul.f32 %v964_v4, %v284_v10  ;;  %v110_v13 = vmul.f32 %v1108_v11, %v1108_v11  ;;  %v104_v25 = vsel %vm20_vm0, %v1108_v11, 0.0 }
 0x11f   :  { %v289_v14 = vsel %vm288_vm9, %v964_v4, %v285_v12  ;;  %v112_v15 = vsel %vm20_vm0, %v110_v13, 0.0 }
 0x120   :  { %v291_v16 = vmul.f32 %v289_v14, %v267_v6  ;;  %113 = vadd.xlane.f32.xlu0 %v112_v15 }
 0x122   :  { %v293_v18 = vmax.f32 %v291_v16, 0.0 }
 0x124   :  { %v1119_v19 = vadd.f32 %v1116_v17, %v293_v18  ;;  %v101_v20 = vpop.f32.mrf.mxu0 }
 0x125   :  { %v107_v21 = vsel %vm20_vm0, %v101_v20, 0.0  ;;  %v111_v23 = vmul.f32 %v101_v20, %v101_v20 }
 0x126   :  { %v301_v22 = vsel %vm20_vm0, %v1119_v19, 0.0  ;;  %108 = vadd.xlane.f32.xlu2 %v107_v21 }
 0x127   :  { %302 = vadd.xlane.f32.xlu1 %v301_v22  ;;  %v115_v24 = vsel %vm20_vm0, %v111_v23, 0.0  ;;  %v266_v23 = vsub.f32 %v1098_v31, %v256_v45 }
 0x12e   :  { %116 = vadd.xlane.f32.xlu2 %v115_v24  ;;  %v305_v24 = vmul.f32 %v1119_v19, %v1119_v19 }
 0x136   :  { %105 = vadd.xlane.f32.xlu2 %v104_v25 }
 0x13e   :  { %251 = vadd.xlane.f32.xlu2 %v250_v27 }
 0x193   :  { %v114_v37 = vpop.xlane.xlu0 %113 }
 0x194   :  { %v120_v40 = vmul.f32 0.03125, %v114_v37 }
 0x199   :  { %v109_v28 = vpop.xlane.xlu2 %108 }
 0x19a   :  { %v119_v29 = vmul.f32 0.03125, %v109_v28  ;;  %v309_v28 = vsel %vm20_vm0, %v305_v24, 0.0 }
 0x19c   :  { %v123_v32 = vmul.f32 %v119_v29, %v119_v29  ;;  %v129_v60 = vsub.f32 %v101_v20, %v119_v29 }
 0x1a1   :  { %v117_v30 = vpop.xlane.xlu2 %116 }
 0x1a2   :  { %v121_v33 = vmul.f32 0.03125, %v117_v30 }
 0x1a4   :  { %v125_v34 = vsub.f32 %v121_v33, %v123_v32 }
 0x1a6   :  { %v127_v35 = vmax.f32 %v125_v34, 0.0 }
 0x1a8   :  { %v131_v36 = vadd.f32 1e-05, %v127_v35 }
 0x1a9   :  { %v106_v38 = vpop.xlane.xlu2 %105 }
 0x1aa   :  { %965 = vrsqrt.f32 %v131_v36  ;;  %v118_v39 = vmul.f32 0.03125, %v106_v38  ;;  %vm148_vm11 = vweird.f32 %v131_v36  ;;  %v303_v38 = vpop.xlane.xlu1 %302 }
 0x1ac   :  { %v122_v41 = vmul.f32 %v118_v39, %v118_v39  ;;  %v128_v6 = vsub.f32 %v1108_v11, %v118_v39 }
 0x1ae   :  { %v124_v43 = vsub.f32 %v120_v40, %v122_v41 }
 0x1b0   :  { %v966_v44 = vpop.eup %965  ;;  %v126_v46 = vmax.f32 %v124_v43, 0.0  ;;  %v313_v43 = vmul.f32 0.03125, %v303_v38 }
 0x1b1   :  { %v143_v47 = vmul.f32 %v966_v44, %v131_v36  ;;  %v252_v48 = vpop.xlane.xlu2 %251  ;;  %vm149_vm10 = vweird.f32 %v966_v44 }
 0x1b2   :  { %v130_v50 = vadd.f32 1e-05, %v126_v46  ;;  %v258_v51 = vmul.f32 0.03125, %v252_v48  ;;  %vm150_vm12 = vmor %vm148_vm11, %vm149_vm10  ;;  %v317_v46 = vmul.f32 %v313_v43, %v313_v43 }
 0x1b3   :  { %v144_v52 = vmul.f32 %v966_v44, %v143_v47 }
 0x1b4   :  { %967 = vrsqrt.f32 %v130_v50  ;;  %v262_v53 = vsub.f32 %v258_v51, %v260_v49  ;;  %vm138_vm14 = vweird.f32 %v130_v50 }
 0x1b5   :  { %v145_v54 = vmul.f32 0.5, %v144_v52 }
 0x1b6   :  { %v264_v55 = vmax.f32 %v262_v53, 0.0 }
 0x1b7   :  { %v146_v56 = vsub.f32 1.5, %v145_v54 }
 0x1b8   :  { %v268_v57 = vadd.f32 1e-05, %v264_v55 }
 0x1b9   :  { %v147_v58 = vmul.f32 %v966_v44, %v146_v56 }
 0x1ba   :  { %v968_v59 = vpop.eup %967  ;;  %969 = vrsqrt.f32 %v268_v57  ;;  %vm276_vm2 = vweird.f32 %v268_v57 }
 0x1bb   :  { %v151_v61 = vsel %vm150_vm12, %v966_v44, %v147_v58  ;;  %v133_v62 = vmul.f32 %v968_v59, %v130_v50  ;;  %vm139_vm13 = vweird.f32 %v968_v59 }
 0x1bc   :  { %v153_v63 = vmul.f32 %v151_v61, %v129_v60  ;;  %vm140_vm15 = vmor %vm138_vm14, %vm139_vm13 }
 0x1bd   :  { %v134_v0 = vmul.f32 %v968_v59, %v133_v62 }
 0x1be   :  { %v156_v1 = vmul.f32 1.442695, %v153_v63 }
 0x1bf   :  { %v135_v3 = vmul.f32 0.5, %v134_v0 }
 0x1c0   :  { %v970_v4 = vpop.eup %969  ;;  %971 = vpow2.f32 %v156_v1 }
 0x1c1   :  { %v136_v7 = vsub.f32 1.5, %v135_v3  ;;  %v271_v8 = vmul.f32 %v970_v4, %v268_v57  ;;  %vm277_vm1 = vweird.f32 %v970_v4 }
 0x1c2   :  { %vm278_vm3 = vmor %vm276_vm2, %vm277_vm1 }
 0x1c3   :  { %v137_v9 = vmul.f32 %v968_v59, %v136_v7  ;;  %v272_v10 = vmul.f32 %v970_v4, %v271_v8 }
 0x1c5   :  { %v141_v12 = vsel %vm140_vm15, %v968_v59, %v137_v9  ;;  %v273_v13 = vmul.f32 0.5, %v272_v10 }
 0x1c6   :  { %v1131_v14 = vpop.eup %971  ;;  %v152_v15 = vmul.f32 %v141_v12, %v128_v6 }
 0x1c7   :  { %v274_v16 = vsub.f32 1.5, %v273_v13  ;;  %v161_v18 = vsel %vm20_vm0, %v1131_v14, 0.0  ;;  %v165_v20 = vmul.f32 %v1131_v14, %v1131_v14 }
 0x1c8   :  { %v154_v21 = vmul.f32 1.442695, %v152_v15  ;;  %162 = vadd.xlane.f32.xlu0 %v161_v18 }
 0x1c9   :  { %v169_v22 = vsel %vm20_vm0, %v165_v20, 0.0  ;;  %v275_v11 = vmul.f32 %v970_v4, %v274_v16 }
 0x1ca   :  { %973 = vpow2.f32 %v154_v21  ;;  %170 = vadd.xlane.f32.xlu2 %v169_v22 }
 0x1cb   :  { %v279_v25 = vsel %vm278_vm3, %v970_v4, %v275_v11 }
 0x1cc   :  { %v290_v26 = vmul.f32 %v279_v25, %v266_v23  ;;  %v323_v25 = vsub.f32 %v1119_v19, %v313_v43 }
 0x1ce   :  { %v292_v27 = vmax.f32 %v290_v26, 0.0 }
 0x1d0   :  { %v1142_v29 = vpop.eup %973  ;;  %310 = vadd.xlane.f32.xlu0 %v309_v28  ;;  %v1145_v30 = vadd.f32 %v1116_v17, %v292_v27 }
 0x1d1   :  { %v158_v31 = vsel %vm20_vm0, %v1142_v29, 0.0  ;;  %v164_v33 = vmul.f32 %v1142_v29, %v1142_v29 }
 0x1d2   :  { %159 = vadd.xlane.f32.xlu1 %v158_v31  ;;  %v298_v32 = vsel %vm20_vm0, %v1145_v30, 0.0  ;;  %v304_v34 = vmul.f32 %v1145_v30, %v1145_v30 }
 0x1d3   :  { %299 = vadd.xlane.f32.xlu2 %v298_v32  ;;  %v166_v35 = vsel %vm20_vm0, %v164_v33, 0.0 }
 0x1d4   :  { %v306_v17 = vsel %vm20_vm0, %v304_v34, 0.0  ;;  %v958_v34 = vld [vmem:[%s1426_s2 + $0x34] ss:$0 sm:$0xff] }
 0x1d8   :  { %167 = vadd.xlane.f32.xlu0 %v166_v35 }
 0x1da   :  { %307 = vadd.xlane.f32.xlu1 %v306_v17 }
 0x23b   :  { %v163_v36 = vpop.xlane.xlu0 %162 }
 0x23c   :  { %v1157_v37 = vmul.f32 0.03125, %v163_v36 }
 0x23d   :  { %v171_v39 = vpop.xlane.xlu2 %170 }
 0x23e   :  { %v177_v40 = vmul.f32 %v1157_v37, %v1157_v37  ;;  %v175_v41 = vmul.f32 0.03125, %v171_v39  ;;  %v183_v26 = vsub.f32 %v1131_v14, %v1157_v37 }
 0x240   :  { %v179_v42 = vsub.f32 %v175_v41, %v177_v40 }
 0x242   :  { %v181_v44 = vmax.f32 %v179_v42, 0.0 }
 0x243   :  { %v311_v45 = vpop.xlane.xlu0 %310 }
 0x244   :  { %v185_v47 = vadd.f32 1e-05, %v181_v44  ;;  %v315_v48 = vmul.f32 0.03125, %v311_v45 }
 0x245   :  { %v160_v49 = vpop.xlane.xlu1 %159 }
 0x246   :  { %975 = vrsqrt.f32 %v185_v47  ;;  %v319_v50 = vsub.f32 %v315_v48, %v317_v46  ;;  %v300_v51 = vpop.xlane.xlu2 %299  ;;  %v1161_v53 = vmul.f32 0.03125, %v160_v49  ;;  %vm202_vm5 = vweird.f32 %v185_v47 }
 0x247   :  { %v1163_v55 = vmul.f32 0.03125, %v300_v51 }
 0x248   :  { %v321_v52 = vmax.f32 %v319_v50, 0.0  ;;  %v176_v58 = vmul.f32 %v1161_v53, %v1161_v53  ;;  %v182_v43 = vsub.f32 %v1142_v29, %v1161_v53 }
 0x249   :  { %v316_v62 = vmul.f32 %v1163_v55, %v1163_v55  ;;  %v322_v44 = vsub.f32 %v1145_v30, %v1163_v55  ;;  %v388_v55 = vld [vmem:[%s1426_s2 + $0x35] sm:$0x1] }
 0x24a   :  { %v325_v54 = vadd.f32 1e-05, %v321_v52 }
 0x24b   :  { %v168_v56 = vpop.xlane.xlu0 %167 }
 0x24c   :  { %v976_v57 = vpop.eup %975  ;;  %977 = vrsqrt.f32 %v325_v54  ;;  %v174_v59 = vmul.f32 0.03125, %v168_v56  ;;  %vm342_vm8 = vweird.f32 %v325_v54 }
 0x24d   :  { %v197_v60 = vmul.f32 %v976_v57, %v185_v47  ;;  %v308_v61 = vpop.xlane.xlu1 %307  ;;  %vm203_vm4 = vweird.f32 %v976_v57 }
 0x24e   :  { %v178_v63 = vsub.f32 %v174_v59, %v176_v58  ;;  %v314_v0 = vmul.f32 0.03125, %v308_v61  ;;  %vm204_vm7 = vmor %vm202_vm5, %vm203_vm4 }
 0x24f   :  { %v198_v1 = vmul.f32 %v976_v57, %v197_v60  ;;  %v389_v60 = vld [vmem:[%s1426_s2 + $0x36] sm:$0x1] }
 0x250   :  { %v180_v3 = vmax.f32 %v178_v63, 0.0  ;;  %v318_v4 = vsub.f32 %v314_v0, %v316_v62  ;;  %v390_v63 = vsub.f32 %v388_v55, %v389_v60  ;;  %v446_v55 = vld [vmem:[%s1426_s2] sm:$0xff] }
 0x251   :  { %v199_v7 = vmul.f32 0.5, %v198_v1  ;;  %v450_v60 = vld [vmem:[%s1426_s2 + $0x20] sm:$0xff] }
 0x252   :  { %v978_v8 = vpop.eup %977  ;;  %v184_v9 = vadd.f32 1e-05, %v180_v3  ;;  %v320_v10 = vmax.f32 %v318_v4, 0.0  ;;  %v391_v4 = vperm.slane %v390_v63, 0  ;;  %v448_v63 = vld [vmem:[%s1426_s2 + $0x10] sm:$0xff] }
 0x253   :  { %v200_v6 = vsub.f32 1.5, %v199_v7  ;;  %v337_v12 = vmul.f32 %v978_v8, %v325_v54  ;;  %vm343_vm6 = vweird.f32 %v978_v8 }
 0x254   :  { %979 = vrsqrt.f32 %v184_v9  ;;  %v324_v13 = vadd.f32 1e-05, %v320_v10  ;;  %vm344_vm9 = vmor %vm342_vm8, %vm343_vm6  ;;  %vm192_vm11 = vweird.f32 %v184_v9 }
 0x255   :  { %v338_v15 = vmul.f32 %v978_v8, %v337_v12  ;;  %v201_v18 = vmul.f32 %v976_v57, %v200_v6 }
 0x256   :  { %981 = vrsqrt.f32 %v324_v13  ;;  %vm332_vm14 = vweird.f32 %v324_v13 }
 0x257   :  { %v339_v16 = vmul.f32 0.5, %v338_v15  ;;  %v205_v11 = vsel %vm204_vm7, %v976_v57, %v201_v18 }
 0x258   :  { %v207_v32 = vmul.f32 %v205_v11, %v183_v26 }
 0x259   :  { %v340_v20 = vsub.f32 1.5, %v339_v16 }
 0x25a   :  { %v980_v21 = vpop.eup %979 }
 0x25b   :  { %v187_v22 = vmul.f32 %v980_v21, %v184_v9  ;;  %v341_v23 = vmul.f32 %v978_v8, %v340_v20  ;;  %vm193_vm10 = vweird.f32 %v980_v21 }
 0x25c   :  { %v982_v24 = vpop.eup %981  ;;  %vm194_vm13 = vmor %vm192_vm11, %vm193_vm10 }
 0x25d   :  { %v188_v27 = vmul.f32 %v980_v21, %v187_v22  ;;  %v327_v28 = vmul.f32 %v982_v24, %v324_v13  ;;  %v345_v31 = vsel %vm344_vm9, %v978_v8, %v341_v23  ;;  %vm333_vm12 = vweird.f32 %v982_v24 }
 0x25e   :  { %v347_v33 = vmul.f32 %v345_v31, %v323_v25  ;;  %vm334_vm15 = vmor %vm332_vm14, %vm333_vm12  ;;  %vm536_vm14 = vcmask 254976  }
 0x25f   :  { %v189_v35 = vmul.f32 0.5, %v188_v27  ;;  %v328_v17 = vmul.f32 %v982_v24, %v327_v28 }
 0x260   :  { %v350_v36 = vsub.f32 %v207_v32, %v347_v33 }
 0x261   :  { %v190_v38 = vsub.f32 1.5, %v189_v35  ;;  %v329_v39 = vmul.f32 0.5, %v328_v17 }
 0x262   :  { %v353_v19 = vmul.f32 %v958_v34, %v350_v36 }
 0x263   :  { %v330_v40 = vsub.f32 1.5, %v329_v39  ;;  %v191_v14 = vmul.f32 %v980_v21, %v190_v38 }
 0x264   :  { %v357_v37 = vsel %vm20_vm0, %v353_v19, 0.0 }
 0x265   :  { %358 = vadd.xlane.f32.xlu2 %v357_v37  ;;  %v195_v41 = vsel %vm194_vm13, %v980_v21, %v191_v14  ;;  %v331_v42 = vmul.f32 %v982_v24, %v330_v40  ;;  %vm458_vm13 = vcmask 64512  }
 0x266   :  { %v206_v46 = vmul.f32 %v195_v41, %v182_v43 }
 0x267   :  { %v335_v45 = vsel %vm334_vm15, %v982_v24, %v331_v42 }
 0x268   :  { %v346_v47 = vmul.f32 %v335_v45, %v322_v44 }
 0x26a   :  { %v349_v48 = vsub.f32 %v206_v46, %v346_v47 }
 0x26c   :  { %v352_v49 = vmul.f32 %v958_v34, %v349_v48 }
 0x26e   :  { %v354_v50 = vsel %vm20_vm0, %v352_v49, 0.0 }
 0x26f   :  { %355 = vadd.xlane.f32.xlu0 %v354_v50 }
 0x2d8   :  { %v359_v51 = vpop.xlane.xlu2 %358 }
 0x2d9   :  { %v361_v52 = vmul.f32 0.5, %v359_v51 }
 0x2db   :  { %v363_v54 = vmul.f32 %v361_v52, %v361_v52 }
 0x2dd   :  { %v365_v56 = vadd.f32 1e-05, %v363_v54 }
 0x2df   :  { %983 = vrsqrt.f32 %v365_v56  ;;  %vm382_vm2 = vweird.f32 %v365_v56 }
 0x2e2   :  { %v356_v57 = vpop.xlane.xlu0 %355 }
 0x2e3   :  { %v360_v58 = vmul.f32 0.5, %v356_v57 }
 0x2e5   :  { %v984_v29 = vpop.eup %983  ;;  %v362_v53 = vmul.f32 %v360_v58, %v360_v58 }
 0x2e6   :  { %v377_v59 = vmul.f32 %v984_v29, %v365_v56  ;;  %vm383_vm1 = vweird.f32 %v984_v29 }
 0x2e7   :  { %v364_v30 = vadd.f32 1e-05, %v362_v53  ;;  %vm384_vm3 = vmor %vm382_vm2, %vm383_vm1 }
 0x2e8   :  { %v378_v61 = vmul.f32 %v984_v29, %v377_v59 }
 0x2e9   :  { %985 = vrsqrt.f32 %v364_v30  ;;  %vm372_vm5 = vweird.f32 %v364_v30 }
 0x2ea   :  { %v379_v62 = vmul.f32 0.5, %v378_v61 }
 0x2ec   :  { %v380_v0 = vsub.f32 1.5, %v379_v62  ;;  %v447_v62 = vld [vmem:[%s1426_s2 + $0x8] sm:$0xff] }
 0x2ee   :  { %v381_v1 = vmul.f32 %v984_v29, %v380_v0  ;;  %v452_v0 = vld [vmem:[%s1426_s2 + $0x30] sm:$0x3] }
 0x2ef   :  { %v986_v3 = vpop.eup %985 }
 0x2f0   :  { %v385_v7 = vsel %vm384_vm3, %v984_v29, %v381_v1  ;;  %v367_v8 = vmul.f32 %v986_v3, %v364_v30  ;;  %vm373_vm4 = vweird.f32 %v986_v3  ;;  %v449_v1 = vld [vmem:[%s1426_s2 + $0x18] sm:$0xff] }
 0x2f1   :  { %v387_v9 = vmul.f32 %v385_v7, %v361_v52  ;;  %vm374_vm6 = vmor %vm372_vm5, %vm373_vm4 }
 0x2f2   :  { %v368_v10 = vmul.f32 %v986_v3, %v367_v8 }
 0x2f3   :  { %v393_v6 = vmul.f32 %v391_v4, %v387_v9 }
 0x2f4   :  { %v369_v12 = vmul.f32 0.5, %v368_v10 }
 0x2f5   :  { %v397_v13 = vsel %vm20_vm0, %v393_v6, 0.0  ;;  %v401_v15 = vmul.f32 %v393_v6, %v393_v6 }
 0x2f6   :  { %v370_v16 = vsub.f32 1.5, %v369_v12  ;;  %398 = vadd.xlane.f32.xlu1 %v397_v13 }
 0x2f7   :  { %v405_v18 = vsel %vm20_vm0, %v401_v15, 0.0 }
 0x2f8   :  { %v371_v20 = vmul.f32 %v986_v3, %v370_v16  ;;  %406 = vadd.xlane.f32.xlu2 %v405_v18 }
 0x2fa   :  { %v375_v21 = vsel %vm374_vm6, %v986_v3, %v371_v20 }
 0x2fb   :  { %v386_v22 = vmul.f32 %v375_v21, %v360_v58 }
 0x2fd   :  { %v392_v11 = vmul.f32 %v391_v4, %v386_v22 }
 0x2ff   :  { %v394_v23 = vsel %vm20_vm0, %v392_v11, 0.0  ;;  %v400_v24 = vmul.f32 %v392_v11, %v392_v11 }
 0x300   :  { %395 = vadd.xlane.f32.xlu0 %v394_v23 }
 0x301   :  { %v402_v25 = vsel %vm20_vm0, %v400_v24, 0.0 }
 0x302   :  { %403 = vadd.xlane.f32.xlu1 %v402_v25 }
 0x369   :  { %v399_v26 = vpop.xlane.xlu1 %398 }
 0x36a   :  { %v409_v27 = vmul.f32 0.03125, %v399_v26 }
 0x36b   :  { %v407_v28 = vpop.xlane.xlu2 %406 }
 0x36c   :  { %v413_v31 = vmul.f32 %v409_v27, %v409_v27  ;;  %v411_v32 = vmul.f32 0.03125, %v407_v28  ;;  %v419_v14 = vsub.f32 %v393_v6, %v409_v27 }
 0x36e   :  { %v415_v33 = vsub.f32 %v411_v32, %v413_v31 }
 0x370   :  { %v417_v34 = vmax.f32 %v415_v33, 0.0 }
 0x372   :  { %v421_v35 = vadd.f32 1e-05, %v417_v34 }
 0x373   :  { %v396_v43 = vpop.xlane.xlu0 %395 }
 0x374   :  { %987 = vrsqrt.f32 %v421_v35  ;;  %vm438_vm8 = vweird.f32 %v421_v35  ;;  %v408_v44 = vmul.f32 0.03125, %v396_v43 }
 0x375   :  { %v404_v45 = vpop.xlane.xlu1 %403 }
 0x376   :  { %v412_v46 = vmul.f32 %v408_v44, %v408_v44  ;;  %v410_v47 = vmul.f32 0.03125, %v404_v45  ;;  %v418_v29 = vsub.f32 %v392_v11, %v408_v44 }
 0x378   :  { %v414_v48 = vsub.f32 %v410_v47, %v412_v46 }
 0x37a   :  { %v988_v17 = vpop.eup %987  ;;  %v416_v49 = vmax.f32 %v414_v48, 0.0 }
 0x37b   :  { %v433_v36 = vmul.f32 %v988_v17, %v421_v35  ;;  %vm439_vm7 = vweird.f32 %v988_v17 }
 0x37c   :  { %vm440_vm9 = vmor %vm438_vm8, %vm439_vm7  ;;  %v420_v50 = vadd.f32 1e-05, %v416_v49 }
 0x37d   :  { %v434_v38 = vmul.f32 %v988_v17, %v433_v36 }
 0x37e   :  { %989 = vrsqrt.f32 %v420_v50  ;;  %vm428_vm11 = vweird.f32 %v420_v50 }
 0x37f   :  { %v435_v39 = vmul.f32 0.5, %v434_v38 }
 0x381   :  { %v436_v19 = vsub.f32 1.5, %v435_v39 }
 0x383   :  { %v437_v40 = vmul.f32 %v988_v17, %v436_v19 }
 0x384   :  { %v990_v51 = vpop.eup %989 }
 0x385   :  { %v441_v37 = vsel %vm440_vm9, %v988_v17, %v437_v40  ;;  %v423_v52 = vmul.f32 %v990_v51, %v420_v50  ;;  %vm429_vm10 = vweird.f32 %v990_v51 }
 0x386   :  { %v443_v41 = vmul.f32 %v441_v37, %v419_v14  ;;  %vm430_vm12 = vmor %vm428_vm11, %vm429_vm10 }
 0x387   :  { %v424_v54 = vmul.f32 %v990_v51, %v423_v52 }
 0x388   :  { %v445_v42 = vadd.f32 %v443_v41, %v1050_v2 }
 0x389   :  { %v425_v56 = vmul.f32 0.5, %v424_v54 }
 0x38a   :  { %454 = vrot.lane.b32.xlu2 %v445_v42, %s1019_s13 }
 0x38b   :  { %v426_v57 = vsub.f32 1.5, %v425_v56 }
 0x38d   :  { %v427_v58 = vmul.f32 %v990_v51, %v426_v57 }
 0x38f   :  { %v431_v2 = vsel %vm430_vm12, %v990_v51, %v427_v58 }
 0x390   :  { %v442_v53 = vmul.f32 %v431_v2, %v418_v29 }
 0x392   :  { %v444_v59 = vadd.f32 %v442_v53, %v1061_v5  ;;  %v451_v5 = vld [vmem:[%s1426_s2 + $0x28] sm:$0xff] }
 0x3e4   :  { %v455_v30 = vpop.permute.xlu2 %454 }
 0x3e5   :  { %v457_v61 = vsel %vm20_vm0, %v444_v59, %v455_v30 }
 0x3e6   :  { %495 = vmatpush.msra.mxu2 %v457_v61  ;;  %953 = vmatpush.msra.mxu3 %v457_v61 }
 0x3e7   :  { %946 = vmatmul.msk.f32.vlgmr.msra.gmra.mxu2 %vm458_vm13, %v446_v55  ;;  %950 = vmatmul.msk.f32.vlgmr.msra.gmra.mxu3 %vm458_vm13, %v450_v60 }
 0x3ef   :  { %951 = vmatmul.msk.f32.gmra.mxu3 %vm458_vm13, %v451_v5  ;;  %947 = vmatmul.msk.f32.gmra.mxu2 %vm458_vm13, %v447_v62 }
 0x3f7   :  { %948 = vmatmul.msk.f32.gmra.mxu2 %vm458_vm13, %v448_v63  ;;  %952 = vmatmul.msk.f32.gmra.mxu3 %vm458_vm13, %v452_v0 }
 0x3ff   :  { %949 = vmatmul.msk.f32.gmra.mxu2 %vm458_vm13, %v449_v1 }
 0x46a   :  { %v1222_v3 = vpop.f32.mrf.mxu2  ;;  %v1224_v4 = vpop.f32.mrf.mxu3 }
 0x46b   :  { %709 = vrot.lane.b32.xlu0 %v1224_v4, %s1020_s27  ;;  %701 = vrot.lane.b32.xlu1 %v1222_v3, %s1020_s27  ;;  %v544_v7 = vmul.f32 %v1224_v4, %v1224_v4  ;;  %v518_v13 = vsel %vm20_vm0, %v1222_v3, 0.0  ;;  %v530_v15 = vsel %vm20_vm0, %v1224_v4, 0.0  ;;  %v540_v21 = vmul.f32 %v1222_v3, %v1222_v3 }
 0x46d   :  { %v547_v11 = vsel %vm20_vm0, %v540_v21, 0.0  ;;  %v559_v23 = vsel %vm20_vm0, %v544_v7, 0.0 }
 0x472   :  { %v1232_v8 = vpop.f32.mrf.mxu3  ;;  %v1234_v9 = vpop.f32.mrf.mxu2 }
 0x473   :  { %758 = vrot.lane.b32.xlu1 %v544_v7, %s1020_s27  ;;  %v545_v10 = vmul.f32 %v1232_v8, %v1232_v8  ;;  %v521_v16 = vsel %vm20_vm0, %v1234_v9, 0.0  ;;  %v533_v18 = vsel %vm20_vm0, %v1232_v8, 0.0  ;;  %v541_v22 = vmul.f32 %v1234_v9, %v1234_v9 }
 0x475   :  { %760 = vrot.lane.b32.xlu2 %v545_v10, %s1020_s27  ;;  %v550_v24 = vsel %vm20_vm0, %v541_v22, 0.0  ;;  %v562_v25 = vsel %vm20_vm0, %v545_v10, 0.0 }
 0x47a   :  { %v1240_v6 = vpop.f32.mrf.mxu2  ;;  %v1246_v12 = vpop.f32.mrf.mxu3 }
 0x47b   :  { %711 = vrot.lane.b32.xlu1 %v1232_v8, %s1020_s27  ;;  %v537_v20 = vsel %vm536_vm14, %v1246_v12, 0.0  ;;  %v542_v26 = vmul.f32 %v1240_v6, %v1240_v6  ;;  %v524_v28 = vsel %vm20_vm0, %v1240_v6, 0.0  ;;  %v546_v33 = vmul.f32 %v1246_v12, %v1246_v12 }
 0x47d   :  { %705 = vrot.lane.b32.xlu2 %v1240_v6, %s1020_s27  ;;  %v553_v60 = vsel %vm20_vm0, %v542_v26, 0.0 }
 0x482   :  { %v1275_v27 = vpop.f32.mrf.mxu2 }
 0x483   :  { %v527_v17 = vsel %vm20_vm0, %v1275_v27, 0.0  ;;  %v1290_v36 = vmul.f32 %v1275_v27, %v1275_v27 }
 0x485   :  { %713 = vrot.lane.b32.xlu2 %v1246_v12, %s1020_s27  ;;  %v556_v19 = vsel %vm20_vm0, %v1290_v36, 0.0 }
 0x495   :  { %519 = vadd.xlane.f32.xlu0 %v518_v13 }
 0x49d   :  { %531 = vadd.xlane.f32.xlu0 %v530_v15  ;;  %v565_v15 = vsel %vm536_vm14, %v546_v33, 0.0 }
 0x4a5   :  { %522 = vadd.xlane.f32.xlu1 %v521_v16 }
 0x4ad   :  { %534 = vadd.xlane.f32.xlu1 %v533_v18 }
 0x4ae   :  { %538 = vadd.xlane.f32.xlu2 %v537_v20 }
 0x4b1   :  { %750 = vrot.lane.b32.xlu0 %v540_v21, %s1020_s27 }
 0x4c6   :  { %752 = vrot.lane.b32.xlu1 %v541_v22, %s1020_s27  ;;  %754 = vrot.lane.b32.xlu2 %v542_v26, %s1020_s27 }
 0x4cf   :  { %v1297_v44 = vpop.permute.xlu2 %760 }
 0x4d7   :  { %v1304_v57 = vpop.permute.xlu2 %705 }
 0x4db   :  { %548 = vadd.xlane.f32.xlu0 %v547_v11 }
 0x4dd   :  { %v702_v31 = vpop.permute.xlu1 %701  ;;  %v710_v32 = vpop.permute.xlu0 %709 }
 0x4de   :  { %v722_v37 = vsel %vm20_vm0, %v702_v31, 0.0  ;;  %v734_v48 = vsel %vm20_vm0, %v710_v32, 0.0 }
 0x4df   :  { %v714_v0 = vpop.permute.xlu2 %713 }
 0x4e3   :  { %560 = vadd.xlane.f32.xlu0 %v559_v23 }
 0x4e5   :  { %v1283_v35 = vpop.permute.xlu1 %758 }
 0x4ed   :  { %v1292_v38 = vpop.permute.xlu1 %711 }
 0x4f0   :  { %551 = vadd.xlane.f32.xlu1 %v550_v24 }
 0x4f7   :  { %703 = vrot.lane.b32.xlu0 %v1234_v9, %s1020_s27 }
 0x4f8   :  { %563 = vadd.xlane.f32.xlu1 %v562_v25 }
 0x508   :  { %v520_v34 = vpop.xlane.xlu0 %519 }
 0x509   :  { %v568_v41 = vmul.f32 0.03125, %v520_v34 }
 0x50b   :  { %v582_v43 = vmul.f32 %v568_v41, %v568_v41  ;;  %v603_v21 = vsub.f32 %v1222_v3, %v568_v41 }
 0x510   :  { %v532_v39 = vpop.xlane.xlu0 %531 }
 0x511   :  { %707 = vrot.lane.b32.xlu1 %v1275_v27, %s1020_s27  ;;  %v1300_v49 = vmul.f32 0.03125, %v532_v39 }
 0x513   :  { %v586_v54 = vmul.f32 %v1300_v49, %v1300_v49 }
 0x518   :  { %v523_v14 = vpop.xlane.xlu1 %522 }
 0x519   :  { %v1310_v61 = vmul.f32 0.03125, %v523_v14 }
 0x51b   :  { %v583_v62 = vmul.f32 %v1310_v61, %v1310_v61 }
 0x520   :  { %v535_v46 = vpop.xlane.xlu1 %534 }
 0x521   :  { %525 = vadd.xlane.f32.xlu0 %v524_v28  ;;  %v573_v24 = vmul.f32 0.03125, %v535_v46 }
 0x523   :  { %v751_v40 = vpop.permute.xlu0 %750 }
 0x524   :  { %v771_v29 = vsel %vm20_vm0, %v751_v40, 0.0 }
 0x535   :  { %762 = vrot.lane.b32.xlu0 %v546_v33, %s1020_s27  ;;  %v587_v33 = vmul.f32 %v573_v24, %v573_v24 }
 0x538   :  { %v1306_v2 = vpop.permute.xlu1 %752 }
 0x53b   :  { %528 = vadd.xlane.f32.xlu1 %v527_v17 }
 0x543   :  { %557 = vadd.xlane.f32.xlu1 %v556_v19  ;;  %v1319_v19 = vpop.xlane.xlu2 %538 }
 0x54b   :  { %723 = vadd.xlane.f32.xlu1 %v722_v37  ;;  %v607_v37 = vsub.f32 %v1224_v4, %v1300_v49 }
 0x54e   :  { %v549_v42 = vpop.xlane.xlu0 %548 }
 0x54f   :  { %v575_v45 = vmul.f32 0.03125, %v549_v42 }
 0x551   :  { %v589_v47 = vsub.f32 %v575_v45, %v582_v43  ;;  %v740_v43 = vsel %vm536_vm14, %v714_v0, 0.0  ;;  %v608_v0 = vsub.f32 %v1232_v8, %v573_v24 }
 0x553   :  { %v596_v50 = vmax.f32 %v589_v47, 0.0  ;;  %735 = vadd.xlane.f32.xlu1 %v734_v48 }
 0x555   :  { %v610_v51 = vadd.f32 1e-05, %v596_v50 }
 0x556   :  { %v561_v52 = vpop.xlane.xlu0 %560 }
 0x557   :  { %991 = vrsqrt.f32 %v610_v51  ;;  %v579_v56 = vmul.f32 0.03125, %v561_v52  ;;  %vm623_vm1 = vweird.f32 %v610_v51 }
 0x559   :  { %v593_v58 = vsub.f32 %v579_v56, %v586_v54 }
 0x55b   :  { %v600_v53 = vmax.f32 %v593_v58, 0.0  ;;  %772 = vadd.xlane.f32.xlu1 %v771_v29 }
 0x55d   :  { %v992_v59 = vpop.eup %991  ;;  %v614_v30 = vadd.f32 1e-05, %v600_v53  ;;  %v604_v53 = vsub.f32 %v1234_v9, %v1310_v61  ;;  %v786_v61 = vsel %vm20_vm0, %v1297_v44, 0.0 }
 0x55e   :  { %v618_v55 = vmul.f32 %v992_v59, %v610_v51  ;;  %vm624_vm15 = vweird.f32 %v992_v59  ;;  %v755_v51 = vpop.permute.xlu2 %754 }
 0x55f   :  { %993 = vrsqrt.f32 %v614_v30  ;;  %554 = vadd.xlane.f32.xlu0 %v553_v60  ;;  %vm625_vm2 = vmor %vm623_vm1, %vm624_vm15  ;;  %vm663_vm4 = vweird.f32 %v614_v30  ;;  %v777_v54 = vsel %vm20_vm0, %v755_v51, 0.0 }
 0x560   :  { %v619_v5 = vmul.f32 %v992_v59, %v618_v55 }
 0x562   :  { %v620_v63 = vmul.f32 0.5, %v619_v5 }
 0x563   :  { %v552_v1 = vpop.xlane.xlu1 %551 }
 0x564   :  { %v621_v7 = vsub.f32 1.5, %v620_v63  ;;  %v576_v10 = vmul.f32 0.03125, %v552_v1 }
 0x565   :  { %v994_v13 = vpop.eup %993 }
 0x566   :  { %v622_v16 = vmul.f32 %v992_v59, %v621_v7  ;;  %v658_v18 = vmul.f32 %v994_v13, %v614_v30  ;;  %v590_v20 = vsub.f32 %v576_v10, %v583_v62  ;;  %vm664_vm3 = vweird.f32 %v994_v13 }
 0x567   :  { %566 = vadd.xlane.f32.xlu0 %v565_v15  ;;  %vm665_vm5 = vmor %vm663_vm4, %vm664_vm3  ;;  %v737_v10 = vsel %vm20_vm0, %v1292_v38, 0.0 }
 0x568   :  { %v626_v22 = vsel %vm625_vm2, %v992_v59, %v622_v16  ;;  %v659_v11 = vmul.f32 %v994_v13, %v658_v18  ;;  %v597_v23 = vmax.f32 %v590_v20, 0.0  ;;  %v728_v18 = vsel %vm20_vm0, %v1304_v57, 0.0 }
 0x569   :  { %v1316_v25 = vmul.f32 %v626_v22, %v603_v21  ;;  %v704_v26 = vpop.permute.xlu0 %703 }
 0x56a   :  { %v660_v28 = vmul.f32 0.5, %v659_v11  ;;  %v611_v31 = vadd.f32 1e-05, %v597_v23  ;;  %v725_v32 = vsel %vm20_vm0, %v704_v26, 0.0  ;;  %v783_v23 = vsel %vm20_vm0, %v1283_v35, 0.0 }
 0x56b   :  { %v564_v34 = vpop.xlane.xlu1 %563  ;;  %726 = vadd.xlane.f32.xlu2 %v725_v32 }
 0x56c   :  { %v661_v17 = vsub.f32 1.5, %v660_v28  ;;  %995 = vrsqrt.f32 %v611_v31  ;;  %v580_v39 = vmul.f32 0.03125, %v564_v34  ;;  %vm633_vm6 = vweird.f32 %v611_v31 }
 0x56e   :  { %v662_v40 = vmul.f32 %v994_v13, %v661_v17  ;;  %v594_v14 = vsub.f32 %v580_v39, %v587_v33 }
 0x570   :  { %v666_v41 = vsel %vm665_vm5, %v994_v13, %v662_v40  ;;  %v601_v42 = vmax.f32 %v594_v14, 0.0  ;;  %v774_v13 = vsel %vm20_vm0, %v1306_v2, 0.0  ;;  %vm925_vm5 = vcmask 523264  }
 0x571   :  { %v1324_v45 = vmul.f32 %v666_v41, %v607_v37 }
 0x572   :  { %v996_v46 = vpop.eup %995  ;;  %v615_v47 = vadd.f32 1e-05, %v601_v42 }
 0x573   :  { %v628_v48 = vmul.f32 %v996_v46, %v611_v31  ;;  %741 = vadd.xlane.f32.xlu2 %v740_v43  ;;  %vm634_vm7 = vweird.f32 %v996_v46 }
 0x574   :  { %997 = vrsqrt.f32 %v615_v47  ;;  %vm635_vm8 = vmor %vm633_vm6, %vm634_vm7  ;;  %vm673_vm10 = vweird.f32 %v615_v47 }
 0x575   :  { %v629_v50 = vmul.f32 %v996_v46, %v628_v48 }
 0x577   :  { %v630_v52 = vmul.f32 0.5, %v629_v50 }
 0x579   :  { %v631_v56 = vsub.f32 1.5, %v630_v52 }
 0x57a   :  { %v998_v49 = vpop.eup %997 }
 0x57b   :  { %v632_v58 = vmul.f32 %v996_v46, %v631_v56  ;;  %v668_v29 = vmul.f32 %v998_v49, %v615_v47  ;;  %756 = vrot.lane.b32.xlu0 %v1290_v36, %s1020_s27  ;;  %778 = vadd.xlane.f32.xlu2 %v777_v54  ;;  %vm674_vm9 = vweird.f32 %v998_v49 }
 0x57c   :  { %vm675_vm11 = vmor %vm673_vm10, %vm674_vm9 }
 0x57d   :  { %v636_v59 = vsel %vm635_vm8, %v996_v46, %v632_v58  ;;  %v669_v30 = vmul.f32 %v998_v49, %v668_v29 }
 0x57e   :  { %v1331_v55 = vmul.f32 %v636_v59, %v604_v53 }
 0x57f   :  { %v670_v60 = vmul.f32 0.5, %v669_v30 }
 0x581   :  { %v671_v5 = vsub.f32 1.5, %v670_v60 }
 0x583   :  { %v672_v62 = vmul.f32 %v998_v49, %v671_v5  ;;  %v708_v63 = vpop.permute.xlu1 %707 }
 0x584   :  { %v731_v36 = vsel %vm20_vm0, %v708_v63, 0.0 }
 0x585   :  { %v676_v1 = vsel %vm675_vm11, %v998_v49, %v672_v62  ;;  %732 = vadd.xlane.f32.xlu2 %v731_v36  ;;  %v574_v49 = vmul.f32 0.03125, %v1319_v19 }
 0x586   :  { %v1335_v7 = vmul.f32 %v676_v1, %v608_v0 }
 0x587   :  { %v588_v53 = vmul.f32 %v574_v49, %v574_v49 }
 0x58d   :  { %787 = vadd.xlane.f32.xlu2 %v786_v61 }
 0x594   :  { %v526_v2 = vpop.xlane.xlu0 %525 }
 0x595   :  { %v570_v40 = vmul.f32 0.03125, %v526_v2 }
 0x597   :  { %v584_v48 = vmul.f32 %v570_v40, %v570_v40 }
 0x5a5   :  { %738 = vadd.xlane.f32.xlu0 %v737_v10 }
 0x5a7   :  { %v1349_v57 = vpop.permute.xlu0 %762 }
 0x5ad   :  { %775 = vadd.xlane.f32.xlu0 %v774_v13 }
 0x5ae   :  { %v529_v15 = vpop.xlane.xlu1 %528 }
 0x5af   :  { %v571_v16 = vmul.f32 0.03125, %v529_v15 }
 0x5b1   :  { %v585_v20 = vmul.f32 %v571_v16, %v571_v16  ;;  %v606_v14 = vsub.f32 %v1275_v27, %v571_v16 }
 0x5b5   :  { %729 = vadd.xlane.f32.xlu0 %v728_v18 }
 0x5b6   :  { %v558_v21 = vpop.xlane.xlu1 %557 }
 0x5b7   :  { %v578_v22 = vmul.f32 0.03125, %v558_v21 }
 0x5b9   :  { %v592_v11 = vsub.f32 %v578_v22, %v585_v20 }
 0x5bb   :  { %v599_v44 = vmax.f32 %v592_v11, 0.0 }
 0x5bd   :  { %v613_v38 = vadd.f32 1e-05, %v599_v44  ;;  %784 = vadd.xlane.f32.xlu0 %v783_v23  ;;  %v605_v23 = vsub.f32 %v1240_v6, %v570_v40  ;;  %v789_v40 = vsel %vm536_vm14, %v1349_v57, 0.0 }
 0x5be   :  { %v724_v24 = vpop.xlane.xlu1 %723 }
 0x5bf   :  { %999 = vrsqrt.f32 %v613_v38  ;;  %vm653_vm12 = vweird.f32 %v613_v38  ;;  %v792_v34 = vmul.f32 0.03125, %v724_v24 }
 0x5c1   :  { %v806_v37 = vmul.f32 %v792_v34, %v792_v34  ;;  %v827_v16 = vsub.f32 %v1222_v3, %v792_v34 }
 0x5c5   :  { %v1000_v26 = vpop.eup %999 }
 0x5c6   :  { %v648_v28 = vmul.f32 %v1000_v26, %v613_v38  ;;  %v1347_v31 = vpop.xlane.xlu1 %735  ;;  %vm654_vm13 = vweird.f32 %v1000_v26 }
 0x5c7   :  { %vm655_vm15 = vmor %vm653_vm12, %vm654_vm13 }
 0x5c8   :  { %v649_v32 = vmul.f32 %v1000_v26, %v648_v28 }
 0x5ca   :  { %v650_v33 = vmul.f32 0.5, %v649_v32 }
 0x5cc   :  { %v651_v17 = vsub.f32 1.5, %v650_v33 }
 0x5ce   :  { %v652_v39 = vmul.f32 %v1000_v26, %v651_v17  ;;  %v773_v35 = vpop.xlane.xlu1 %772  ;;  %v609_v17 = vsub.f32 %v1246_v12, %v574_v49 }
 0x5cf   :  { %v799_v41 = vmul.f32 0.03125, %v773_v35 }
 0x5d0   :  { %v656_v42 = vsel %vm655_vm15, %v1000_v26, %v652_v39 }
 0x5d1   :  { %v1352_v43 = vmul.f32 %v656_v42, %v606_v14  ;;  %v813_v46 = vsub.f32 %v799_v41, %v806_v37 }
 0x5d2   :  { %v555_v47 = vpop.xlane.xlu0 %554 }
 0x5d3   :  { %v820_v50 = vmax.f32 %v813_v46, 0.0  ;;  %v577_v51 = vmul.f32 0.03125, %v555_v47 }
 0x5d5   :  { %v834_v52 = vadd.f32 1e-05, %v820_v50  ;;  %v591_v54 = vsub.f32 %v577_v51, %v584_v48 }
 0x5d7   :  { %1001 = vrsqrt.f32 %v834_v52  ;;  %v598_v56 = vmax.f32 %v591_v54, 0.0  ;;  %vm847_vm2 = vweird.f32 %v834_v52 }
 0x5d9   :  { %v612_v58 = vadd.f32 1e-05, %v598_v56 }
 0x5da   :  { %v567_v29 = vpop.xlane.xlu0 %566 }
 0x5db   :  { %1003 = vrsqrt.f32 %v612_v58  ;;  %v581_v59 = vmul.f32 0.03125, %v567_v29  ;;  %vm643_vm6 = vweird.f32 %v612_v58 }
 0x5dd   :  { %v1002_v30 = vpop.eup %1001  ;;  %v595_v60 = vsub.f32 %v581_v59, %v588_v53 }
 0x5de   :  { %v842_v5 = vmul.f32 %v1002_v30, %v834_v52  ;;  %vm848_vm1 = vweird.f32 %v1002_v30 }
 0x5df   :  { %v602_v62 = vmax.f32 %v595_v60, 0.0  ;;  %vm849_vm3 = vmor %vm847_vm2, %vm848_vm1 }
 0x5e0   :  { %v843_v63 = vmul.f32 %v1002_v30, %v842_v5 }
 0x5e1   :  { %v1004_v0 = vpop.eup %1003  ;;  %v616_v36 = vadd.f32 1e-05, %v602_v62 }
 0x5e2   :  { %v844_v1 = vmul.f32 0.5, %v843_v63  ;;  %v638_v61 = vmul.f32 %v1004_v0, %v612_v58  ;;  %vm644_vm4 = vweird.f32 %v1004_v0 }
 0x5e3   :  { %1005 = vrsqrt.f32 %v616_v36  ;;  %vm645_vm7 = vmor %vm643_vm6, %vm644_vm4  ;;  %vm683_vm9 = vweird.f32 %v616_v36 }
 0x5e4   :  { %v845_v10 = vsub.f32 1.5, %v844_v1  ;;  %v639_v13 = vmul.f32 %v1004_v0, %v638_v61  ;;  %v1376_v1 = vmul.f32 0.03125, %v1347_v31 }
 0x5e6   :  { %v846_v15 = vmul.f32 %v1002_v30, %v845_v10  ;;  %v640_v19 = vmul.f32 0.5, %v639_v13 }
 0x5e8   :  { %v850_v18 = vsel %vm849_vm3, %v1002_v30, %v846_v15  ;;  %v641_v20 = vsub.f32 1.5, %v640_v19 }
 0x5e9   :  { %v1006_v21 = vpop.eup %1005  ;;  %v911_v22 = vmul.f32 %v850_v18, %v827_v16 }
 0x5ea   :  { %v642_v11 = vmul.f32 %v1004_v0, %v641_v20  ;;  %v678_v44 = vmul.f32 %v1006_v21, %v616_v36  ;;  %vm684_vm8 = vweird.f32 %v1006_v21  ;;  %v810_v20 = vmul.f32 %v1376_v1, %v1376_v1 }
 0x5eb   :  { %v918_v38 = vsel %vm20_vm0, %v1316_v25, %v911_v22  ;;  %v727_v25 = vpop.xlane.xlu2 %726  ;;  %vm685_vm10 = vmor %vm683_vm9, %vm684_vm8 }
 0x5ec   :  { %926 = vst.msk [vmem:[%s1427_s3] sm:$0xff] %vm925_vm5, %v918_v38  ;;  %v646_v3 = vsel %vm645_vm7, %v1004_v0, %v642_v11  ;;  %v679_v24 = vmul.f32 %v1006_v21, %v678_v44  ;;  %v793_v51 = vmul.f32 0.03125, %v727_v25 }
 0x5ed   :  { %v1363_v2 = vmul.f32 %v646_v3, %v605_v23  ;;  %v757_v26 = vpop.permute.xlu0 %756 }
 0x5ee   :  { %v680_v28 = vmul.f32 0.5, %v679_v24  ;;  %v780_v32 = vsel %vm20_vm0, %v757_v26, 0.0  ;;  %v807_v49 = vmul.f32 %v793_v51, %v793_v51  ;;  %v828_v25 = vsub.f32 %v1234_v9, %v793_v51 }
 0x5ef   :  { %781 = vadd.xlane.f32.xlu1 %v780_v32 }
 0x5f0   :  { %v681_v33 = vsub.f32 1.5, %v680_v28 }
 0x5f2   :  { %v682_v34 = vmul.f32 %v1006_v21, %v681_v33 }
 0x5f3   :  { %v1371_v14 = vpop.xlane.xlu2 %741 }
 0x5f4   :  { %v686_v39 = vsel %vm685_vm10, %v1006_v21, %v682_v34 }
 0x5f5   :  { %v1367_v35 = vmul.f32 %v686_v39, %v609_v17 }
 0x5f7   :  { %790 = vadd.xlane.f32.xlu1 %v789_v40 }
 0x5fb   :  { %v779_v37 = vpop.xlane.xlu2 %778 }
 0x5fc   :  { %v801_v63 = vmul.f32 0.03125, %v779_v37 }
 0x603   :  { %v1373_v41 = vpop.xlane.xlu2 %732 }
 0x60b   :  { %v788_v42 = vpop.xlane.xlu2 %787 }
 0x60c   :  { %v804_v48 = vmul.f32 0.03125, %v788_v42 }
 0x618   :  { %v739_v46 = vpop.xlane.xlu0 %738 }
 0x619   :  { %v797_v47 = vmul.f32 0.03125, %v739_v46 }
 0x61b   :  { %v811_v50 = vmul.f32 %v797_v47, %v797_v47  ;;  %v832_v23 = vsub.f32 %v1232_v8, %v797_v47 }
 0x61d   :  { %v818_v52 = vsub.f32 %v804_v48, %v811_v50 }
 0x61f   :  { %v825_v54 = vmax.f32 %v818_v52, 0.0 }
 0x620   :  { %v776_v56 = vpop.xlane.xlu0 %775 }
 0x621   :  { %v839_v58 = vadd.f32 1e-05, %v825_v54  ;;  %v800_v29 = vmul.f32 0.03125, %v776_v56 }
 0x623   :  { %1007 = vrsqrt.f32 %v839_v58  ;;  %v814_v57 = vsub.f32 %v800_v29, %v807_v49  ;;  %vm897_vm11 = vweird.f32 %v839_v58  ;;  %v831_v29 = vsub.f32 %v1224_v4, %v1376_v1 }
 0x624   :  { %v798_v4 = vmul.f32 0.03125, %v1371_v14 }
 0x625   :  { %v821_v53 = vmax.f32 %v814_v57, 0.0 }
 0x627   :  { %v835_v59 = vadd.f32 1e-05, %v821_v53 }
 0x628   :  { %v730_v30 = vpop.xlane.xlu0 %729 }
 0x629   :  { %v1008_v60 = vpop.eup %1007  ;;  %1009 = vrsqrt.f32 %v835_v59  ;;  %v794_v5 = vmul.f32 0.03125, %v730_v30  ;;  %vm857_vm15 = vweird.f32 %v835_v59 }
 0x62a   :  { %v892_v62 = vmul.f32 %v1008_v60, %v839_v58  ;;  %vm898_vm14 = vweird.f32 %v1008_v60 }
 0x62b   :  { %v808_v0 = vmul.f32 %v794_v5, %v794_v5  ;;  %vm899_vm12 = vmor %vm897_vm11, %vm898_vm14  ;;  %v829_v51 = vsub.f32 %v1240_v6, %v794_v5 }
 0x62c   :  { %v893_v36 = vmul.f32 %v1008_v60, %v892_v62 }
 0x62d   :  { %v815_v61 = vsub.f32 %v801_v63, %v808_v0 }
 0x62e   :  { %v894_v10 = vmul.f32 0.5, %v893_v36  ;;  %v812_v36 = vmul.f32 %v798_v4, %v798_v4 }
 0x62f   :  { %v1010_v13 = vpop.eup %1009  ;;  %v822_v15 = vmax.f32 %v815_v61, 0.0 }
 0x630   :  { %v895_v19 = vsub.f32 1.5, %v894_v10  ;;  %v852_v16 = vmul.f32 %v1010_v13, %v835_v59  ;;  %v785_v18 = vpop.xlane.xlu0 %784  ;;  %vm858_vm13 = vweird.f32 %v1010_v13 }
 0x631   :  { %v836_v21 = vadd.f32 1e-05, %v822_v15  ;;  %v803_v22 = vmul.f32 0.03125, %v785_v18  ;;  %vm859_vm1 = vmor %vm857_vm15, %vm858_vm13  ;;  %vm932_vm15 = vcmask 517120  }
 0x632   :  { %v896_v11 = vmul.f32 %v1008_v60, %v895_v19  ;;  %v853_v44 = vmul.f32 %v1010_v13, %v852_v16 }
 0x633   :  { %1011 = vrsqrt.f32 %v836_v21  ;;  %v817_v31 = vsub.f32 %v803_v22, %v810_v20  ;;  %vm867_vm3 = vweird.f32 %v836_v21 }
 0x634   :  { %v900_v38 = vsel %vm899_vm12, %v1008_v60, %v896_v11  ;;  %v854_v3 = vmul.f32 0.5, %v853_v44 }
 0x635   :  { %v916_v24 = vmul.f32 %v900_v38, %v832_v23  ;;  %v824_v26 = vmax.f32 %v817_v31, 0.0 }
 0x636   :  { %v855_v28 = vsub.f32 1.5, %v854_v3 }
 0x637   :  { %v923_v32 = vsel %vm20_vm0, %v1335_v7, %v916_v24  ;;  %v838_v33 = vadd.f32 1e-05, %v824_v26  ;;  %v833_v24 = vsub.f32 %v1246_v12, %v798_v4 }
 0x638   :  { %931 = vst.msk [vmem:[%s1427_s3 + $0x28] sm:$0xff] %vm925_vm5, %v923_v32  ;;  %v856_v34 = vmul.f32 %v1010_v13, %v855_v28 }
 0x639   :  { %v1012_v8 = vpop.eup %1011  ;;  %1013 = vrsqrt.f32 %v838_v33  ;;  %vm887_vm7 = vweird.f32 %v838_v33 }
 0x63a   :  { %v860_v17 = vsel %vm859_vm1, %v1010_v13, %v856_v34  ;;  %v862_v39 = vmul.f32 %v1012_v8, %v836_v21  ;;  %vm868_vm2 = vweird.f32 %v1012_v8 }
 0x63b   :  { %v912_v40 = vmul.f32 %v860_v17, %v828_v25  ;;  %vm869_vm4 = vmor %vm867_vm3, %vm868_vm2 }
 0x63c   :  { %v863_v37 = vmul.f32 %v1012_v8, %v862_v39 }
 0x63d   :  { %v919_v7 = vsel %vm20_vm0, %v1331_v55, %v912_v40 }
 0x63e   :  { %927 = vst.msk [vmem:[%s1427_s3 + $0x8] sm:$0xff] %vm925_vm5, %v919_v7  ;;  %v864_v42 = vmul.f32 0.5, %v863_v37 }
 0x63f   :  { %v1014_v46 = vpop.eup %1013 }
 0x640   :  { %v865_v47 = vsub.f32 1.5, %v864_v42  ;;  %v882_v48 = vmul.f32 %v1014_v46, %v838_v33  ;;  %vm888_vm6 = vweird.f32 %v1014_v46 }
 0x641   :  { %vm889_vm8 = vmor %vm887_vm7, %vm888_vm6 }
 0x642   :  { %v866_v9 = vmul.f32 %v1012_v8, %v865_v47  ;;  %v883_v50 = vmul.f32 %v1014_v46, %v882_v48 }
 0x644   :  { %v870_v52 = vsel %vm869_vm4, %v1012_v8, %v866_v9  ;;  %v884_v54 = vmul.f32 0.5, %v883_v50 }
 0x645   :  { %v913_v56 = vmul.f32 %v870_v52, %v829_v51 }
 0x646   :  { %v885_v55 = vsub.f32 1.5, %v884_v54 }
 0x647   :  { %v920_v49 = vsel %vm20_vm0, %v1363_v2, %v913_v56  ;;  %v795_v2 = vmul.f32 0.03125, %v1373_v41 }
 0x648   :  { %928 = vst.msk [vmem:[%s1427_s3 + $0x10] sm:$0xff] %vm925_vm5, %v920_v49  ;;  %v886_v58 = vmul.f32 %v1014_v46, %v885_v55 }
 0x649   :  { %v809_v59 = vmul.f32 %v795_v2, %v795_v2  ;;  %v830_v14 = vsub.f32 %v1275_v27, %v795_v2 }
 0x64a   :  { %v890_v6 = vsel %vm889_vm8, %v1014_v46, %v886_v58 }
 0x64b   :  { %v915_v57 = vmul.f32 %v890_v6, %v831_v29 }
 0x64d   :  { %v922_v53 = vsel %vm20_vm0, %v1324_v45, %v915_v57 }
 0x64e   :  { %930 = vst.msk [vmem:[%s1427_s3 + $0x20] sm:$0xff] %vm925_vm5, %v922_v53 }
 0x662   :  { %v782_v30 = vpop.xlane.xlu1 %781 }
 0x663   :  { %v802_v60 = vmul.f32 0.03125, %v782_v30 }
 0x665   :  { %v816_v5 = vsub.f32 %v802_v60, %v809_v59 }
 0x667   :  { %v823_v62 = vmax.f32 %v816_v5, 0.0 }
 0x669   :  { %v837_v63 = vadd.f32 1e-05, %v823_v62 }
 0x66a   :  { %v791_v0 = vpop.xlane.xlu1 %790 }
 0x66b   :  { %1015 = vrsqrt.f32 %v837_v63  ;;  %v805_v1 = vmul.f32 0.03125, %v791_v0  ;;  %vm877_vm10 = vweird.f32 %v837_v63 }
 0x66d   :  { %v819_v45 = vsub.f32 %v805_v1, %v812_v36 }
 0x66f   :  { %v826_v61 = vmax.f32 %v819_v45, 0.0 }
 0x671   :  { %v1016_v10 = vpop.eup %1015  ;;  %v840_v13 = vadd.f32 1e-05, %v826_v61 }
 0x672   :  { %v872_v15 = vmul.f32 %v1016_v10, %v837_v63  ;;  %vm878_vm9 = vweird.f32 %v1016_v10 }
 0x673   :  { %1017 = vrsqrt.f32 %v840_v13  ;;  %vm879_vm14 = vmor %vm877_vm10, %vm878_vm9  ;;  %vm907_vm12 = vweird.f32 %v840_v13 }
 0x674   :  { %v873_v19 = vmul.f32 %v1016_v10, %v872_v15 }
 0x676   :  { %v874_v41 = vmul.f32 0.5, %v873_v19 }
 0x678   :  { %v875_v16 = vsub.f32 1.5, %v874_v41 }
 0x679   :  { %v1018_v18 = vpop.eup %1017 }
 0x67a   :  { %v876_v20 = vmul.f32 %v1016_v10, %v875_v16  ;;  %v902_v21 = vmul.f32 %v1018_v18, %v840_v13  ;;  %vm908_vm11 = vweird.f32 %v1018_v18 }
 0x67b   :  { %vm909_vm13 = vmor %vm907_vm12, %vm908_vm11 }
 0x67c   :  { %v880_v22 = vsel %vm879_vm14, %v1016_v10, %v876_v20  ;;  %v903_v11 = vmul.f32 %v1018_v18, %v902_v21 }
 0x67d   :  { %v914_v44 = vmul.f32 %v880_v22, %v830_v14 }
 0x67e   :  { %v904_v23 = vmul.f32 0.5, %v903_v11 }
 0x67f   :  { %v921_v31 = vsel %vm20_vm0, %v1352_v43, %v914_v44 }
 0x680   :  { %929 = vst.msk [vmem:[%s1427_s3 + $0x18] sm:$0xff] %vm925_vm5, %v921_v31  ;;  %v905_v38 = vsub.f32 1.5, %v904_v23 }
 0x682   :  { %v906_v3 = vmul.f32 %v1018_v18, %v905_v38 }
 0x684   :  { %v910_v27 = vsel %vm909_vm13, %v1018_v18, %v906_v3 }
 0x685   :  { %v917_v26 = vmul.f32 %v910_v27, %v833_v24 }
 0x687   :  { %v924_v28 = vsel %vm20_vm0, %v1367_v35, %v917_v26 }
 0x688   :  { %933 = vst.msk [vmem:[%s1427_s3 + $0x30] sm:$0x3] %vm932_vm15, %v924_v28 }

</bundles_post_ra>
